<compile_context>
chip_gen: v7x
topology: tpu7x:2x2x1
jax: 0.10.0
libtpu: 0.0.40
codegen_flags: <defaults>
</compile_context>

<pallas_src>
import jax
import jax.numpy as jnp
from jax import lax
from jax.experimental import pallas as pl
from jax.experimental.pallas import tpu as pltpu


def _round_up(x, m):
    return (x + m - 1) // m * m


def _sigmoid(x):
    # tanh-based sigmoid: keeps the transcendental on the EUP slot (no VPU divide),
    # exact to float precision.
    return 0.5 * (jnp.tanh(0.5 * x) + 1.0)


# --------------------------------------------------------------------------- #
# Stage 1: recurrent LSTM kernel — single invocation, fori_loop over timesteps #
# --------------------------------------------------------------------------- #
def _lstm_seq_kernel(emb_ref, h0_ref, c0_ref, dl_ref,
                     wih_ref, whh_ref, b_ref, hout_ref):
    """All T LSTMCell steps in one kernel invocation.

    Layouts: emb (T, B_pad, E); weights (E, 4G) / (G, 4G) with each gate in its
    own lane-aligned G-wide column block (pad lanes are zero, so they stay zero
    through the recurrence); h/c are (B_pad, G) loop carries; per-step hidden
    states go to hout_ref[t].  The prediction mask is applied in the FC stage.
    """
    T = emb_ref.shape[0]
    G = h0_ref.shape[1]
    dl = dl_ref[...]                                     # (B_pad, 1) int32, hoisted once

    def step(t, carry):
        h, c = carry
        x = emb_ref[t]                                   # (B_pad, E)
        gates = (jnp.dot(x, wih_ref[...], preferred_element_type=jnp.float32)
                 + jnp.dot(h, whh_ref[...], preferred_element_type=jnp.float32)
                 + b_ref[...])                           # (B_pad, 4G)
        i = _sigmoid(gates[:, 0 * G:1 * G])              # lane-aligned 128-wide slices
        f = _sigmoid(gates[:, 1 * G:2 * G])
        g = jnp.tanh(gates[:, 2 * G:3 * G])
        o = _sigmoid(gates[:, 3 * G:4 * G])
        c_new = f * c + i * g
        h_new = o * jnp.tanh(c_new)
        hout_ref[t] = h_new                              # masked later by the FC stage
        # Freeze h/c for rows whose caption already ended (lengths sorted
        # descending => equivalent to PyTorch's shrinking batch_size_t).
        mask = dl > t                                    # (B_pad, 1)
        return jnp.where(mask, h_new, h), jnp.where(mask, c_new, c)

    lax.fori_loop(0, T, step, (h0_ref[...], c0_ref[...]),
                  unroll=True if T <= 32 else 8)


# --------------------------------------------------------------------------- #
# Stage 2: hoisted vocab projection — one MXU-tiled matmul with mask folded in #
# --------------------------------------------------------------------------- #
def _fc_kernel(h_ref, m_ref, wfc_ref, bfc_ref, out_ref):
    """One (tm, G) x (G, tn) tile of fc(h); rows past decode_length are zeroed."""
    out = (jnp.dot(h_ref[...], wfc_ref[...], preferred_element_type=jnp.float32)
           + bfc_ref[...]) * m_ref[...]
    out_ref[...] = out.astype(out_ref.dtype)


# --------------------------------------------------------------------------- #
# Wrapper                                                                      #
# --------------------------------------------------------------------------- #
def decoder_rnn_sen_forward(params, images, captions, length):
    """Mirrors DecoderRNN_SEN.forward(images, captions, length)."""
    B, E = images.shape
    H = params["w_hh"].shape[1]
    V = params["embedding"].shape[0]

    # ---- glue: sort / gather / embedding lookup (plain JAX) ----
    lengths = length[:, 0]
    sort_ind = jnp.argsort(-lengths)                     # descending sort
    cap_len = lengths[sort_ind]
    features = images[sort_ind].astype(jnp.float32)
    captions_s = captions[sort_ind]
    embeddings = params["embedding"][captions_s].astype(jnp.float32)   # (B, L, E)
    decode_lengths = (cap_len - 1).astype(jnp.int32)
    # TODO(synk): int() forces a host sync; under jax.jit pad to a static max T instead.
    T = int(jnp.max(decode_lengths))

    # ---- padding: batch -> sublane multiple, per-gate width -> lane multiple ----
    B_pad = _round_up(max(B, 8), 8)
    G = _round_up(H, 128)                                # lane-aligned per-gate width

    w_ih = params["w_ih"].astype(jnp.float32)            # (4H, E), gate order i,f,g,o
    w_hh = params["w_hh"].astype(jnp.float32)            # (4H, H)
    b_g = (params["b_ih"] + params["b_hh"]).astype(jnp.float32)        # (4H,)

    wih_pad = jnp.zeros((E, 4 * G), jnp.float32)
    whh_pad = jnp.zeros((G, 4 * G), jnp.float32)
    bias_pad = jnp.zeros((1, 4 * G), jnp.float32)
    for k in range(4):                                   # pad lanes stay exactly zero
        wih_pad = wih_pad.at[:, k * G:k * G + H].set(w_ih[k * H:(k + 1) * H, :].T)
        whh_pad = whh_pad.at[:H, k * G:k * G + H].set(w_hh[k * H:(k + 1) * H, :].T)
        bias_pad = bias_pad.at[:, k * G:k * G + H].set(b_g[k * H:(k + 1) * H][None, :])

    wfc_pad = jnp.zeros((G, V), jnp.float32).at[:H, :].set(
        params["w_fc"].astype(jnp.float32).T)            # (G, V), pad rows zero
    bfc = params["b_fc"].astype(jnp.float32)[None, :]    # (1, V)

    # ---- t=0 feature step in plain JAX (h=c=0 => W_hh term vanishes) ----
    feat_pad = jnp.zeros((B_pad, E), jnp.float32).at[:B].set(features)
    g0 = feat_pad @ w_ih.T + b_g[None, :]
    i0 = _sigmoid(g0[:, 0 * H:1 * H])
    gg0 = jnp.tanh(g0[:, 2 * H:3 * H])
    o0 = _sigmoid(g0[:, 3 * H:4 * H])
    c0 = i0 * gg0
    h0 = o0 * jnp.tanh(c0)
    h0_pad = jnp.zeros((B_pad, G), jnp.float32).at[:, :H].set(h0)
    c0_pad = jnp.zeros((B_pad, G), jnp.float32).at[:, :H].set(c0)

    # ---- kernel inputs ----
    emb_tbe = jnp.zeros((T, B_pad, E), jnp.float32).at[:, :B, :].set(
        jnp.transpose(embeddings[:, :T, :], (1, 0, 2)))  # (T, B_pad, E)
    dl_pad = jnp.zeros((B_pad,), jnp.int32).at[:B].set(decode_lengths)
    dl_col = dl_pad[:, None]                             # (B_pad, 1)

    # ---- stage 1: recurrent kernel (everything VMEM-resident for one call) ----
    # TODO(synk): for very long sequences chunk T with pltpu.emit_pipeline.
    h_all = pl.pallas_call(
        _lstm_seq_kernel,
        out_shape=jax.ShapeDtypeStruct((T, B_pad, G), jnp.float32),
        grid_spec=pltpu.PrefetchScalarGridSpec(
            num_scalar_prefetch=0,
            grid=(1,),
            in_specs=[
                pl.BlockSpec((T, B_pad, E), lambda i: (0, 0, 0)),   # embeddings
                pl.BlockSpec((B_pad, G), lambda i: (0, 0)),         # h0
                pl.BlockSpec((B_pad, G), lambda i: (0, 0)),         # c0
                pl.BlockSpec((B_pad, 1), lambda i: (0, 0)),         # decode_lengths
                pl.BlockSpec((E, 4 * G), lambda i: (0, 0)),         # W_ih (gate-packed)
                pl.BlockSpec((G, 4 * G), lambda i: (0, 0)),         # W_hh (gate-packed)
                pl.BlockSpec((1, 4 * G), lambda i: (0, 0)),         # bias
            ],
            out_specs=pl.BlockSpec((T, B_pad, G), lambda i: (0, 0, 0)),
        ),
        compiler_params=pltpu.CompilerParams(dimension_semantics=("arbitrary",)),
    )(emb_tbe, h0_pad, c0_pad, dl_col, wih_pad, whh_pad, bias_pad)

    # ---- stage 2: hoisted FC projection over all (b, t) rows at once ----
    # Reorder hidden states so row = b*T + t (small H-sized transpose; the final
    # (B, T, V) output then falls out of a free reshape — no vocab-sized transpose).
    h_flat = jnp.transpose(h_all, (1, 0, 2)).reshape(B_pad * T, G)
    mask_flat = (dl_pad[:, None] > jnp.arange(T)[None, :]
                 ).astype(jnp.float32).reshape(B_pad * T, 1)

    M = B_pad * T                                        # multiple of 8 by construction
    tm = M if M <= 512 else 128
    M_pad = _round_up(M, tm)
    tn = 128 if V % 128 == 0 else V
    if M_pad != M:
        h_flat = jnp.zeros((M_pad, G), jnp.float32).at[:M].set(h_flat)
        mask_flat = jnp.zeros((M_pad, 1), jnp.float32).at[:M].set(mask_flat)

    preds_flat = pl.pallas_call(
        _fc_kernel,
        out_shape=jax.ShapeDtypeStruct((M_pad, V), jnp.float32),
        grid_spec=pltpu.PrefetchScalarGridSpec(
            num_scalar_prefetch=0,
            grid=(M_pad // tm, V // tn),
            in_specs=[
                pl.BlockSpec((tm, G), lambda i, j: (i, 0)),    # hidden rows
                pl.BlockSpec((tm, 1), lambda i, j: (i, 0)),    # validity mask
                pl.BlockSpec((G, tn), lambda i, j: (0, j)),    # W_fc^T (H-pad rows zero)
                pl.BlockSpec((1, tn), lambda i, j: (0, j)),    # b_fc
            ],
            out_specs=pl.BlockSpec((tm, tn), lambda i, j: (i, j)),
        ),
        compiler_params=pltpu.CompilerParams(
            dimension_semantics=("parallel", "parallel")),
    )(h_flat, mask_flat, wfc_pad, bfc)

    predictions = preds_flat[:M].reshape(B_pad, T, V)[:B]          # (B, T, V)
    return predictions, captions_s, decode_lengths, sort_ind


# --------------------------------------------------------------------------- #
# Pure-JAX reference (for correctness checking)                                #
# --------------------------------------------------------------------------- #
def reference_forward(params, images, captions, length):
    B, E = images.shape
    H = params["w_hh"].shape[1]
    V = params["embedding"].shape[0]

    lengths = length[:, 0]
    sort_ind = jnp.argsort(-lengths)
    cap_len = lengths[sort_ind]
    features = images[sort_ind].astype(jnp.float32)
    captions_s = captions[sort_ind]
    embeddings = params["embedding"][captions_s]
    decode_lengths = cap_len - 1
    T = int(jnp.max(decode_lengths))

    def sig(z):
        return 1.0 / (1.0 + jnp.exp(-z))

    def lstm(x, h, c):
        gates = (x @ params["w_ih"].T + params["b_ih"]
                 + h @ params["w_hh"].T + params["b_hh"])
        i, f, g, o = jnp.split(gates, 4, axis=1)
        c = sig(f) * c + sig(i) * jnp.tanh(g)
        h = sig(o) * jnp.tanh(c)
        return h, c

    h = jnp.zeros((B, H), jnp.float32)
    c = jnp.zeros((B, H), jnp.float32)
    h, c = lstm(features, h, c)

    preds = jnp.zeros((B, T, V), jnp.float32)
    for t in range(T):
        h, c = lstm(embeddings[:, t, :], h, c)
        p = h @ params["w_fc"].T + params["b_fc"]
        m = (decode_lengths > t)[:, None]
        preds = preds.at[:, t, :].set(jnp.where(m, p, 0.0))
    return preds


if __name__ == "__main__":
    # embed_size=32, hidden_size=32, vocab_size=128, num_layers=1 (LSTMCell ignores it)
    B, E, H, V, L = 4, 32, 32, 128, 8

    key = jax.random.PRNGKey(0)
    ks = jax.random.split(key, 10)
    params = {
        "embedding": jax.random.normal(ks[0], (V, E), jnp.float32) * 0.1,
        "w_ih": jax.random.normal(ks[1], (4 * H, E), jnp.float32) * 0.1,
        "w_hh": jax.random.normal(ks[2], (4 * H, H), jnp.float32) * 0.1,
        "b_ih": jax.random.normal(ks[3], (4 * H,), jnp.float32) * 0.1,
        "b_hh": jax.random.normal(ks[4], (4 * H,), jnp.float32) * 0.1,
        "w_fc": jax.random.normal(ks[5], (V, H), jnp.float32) * 0.1,
        "b_fc": jax.random.normal(ks[6], (V,), jnp.float32) * 0.1,
    }

    images = jax.random.normal(ks[7], (B, E), jnp.float32)            # "image features"
    captions = jax.random.randint(ks[8], (B, L), 0, V, jnp.int32)     # token ids
    length = jax.random.randint(ks[9], (B, 1), 2, L + 1, jnp.int32)   # caption lengths

    predictions, captions_sorted, decode_lengths, sort_ind = decoder_rnn_sen_forward(
        params, images, captions, length)
    predictions = jax.block_until_ready(predictions)

    ref = reference_forward(params, images, captions, length)
    max_err = float(jnp.max(jnp.abs(predictions - ref)))
    assert jnp.allclose(predictions, ref, atol=1e-4, rtol=1e-4), max_err

    print("KERNEL_OK")
</pallas_src>

<mosaic_0001>
module attributes {stable_mosaic.version = 11 : i64} {
  func.func @_lstm_seq_kernel(%arg0: i32, %arg1: memref<4x8x32xf32, #tpu.memory_space<vmem>>, %arg2: memref<8x128xf32, #tpu.memory_space<vmem>>, %arg3: memref<8x128xf32, #tpu.memory_space<vmem>>, %arg4: memref<8x1xi32, #tpu.memory_space<vmem>>, %arg5: memref<32x512xf32, #tpu.memory_space<vmem>>, %arg6: memref<128x512xf32, #tpu.memory_space<vmem>>, %arg7: memref<1x512xf32, #tpu.memory_space<vmem>>, %arg8: memref<4x8x128xf32, #tpu.memory_space<vmem>>) attributes {dimension_semantics = [#tpu.dimension_semantics<arbitrary>], iteration_bounds = array<i64: 1>, scalar_prefetch = 0 : i64, scratch_operands = 0 : i64, tpu.core_type = #tpu.core_type<tc>, window_params = [{pipeline_mode = #tpu.pipeline_mode<synchronous>, transform_indices = @transform_0, window_bounds = array<i64: 4, 8, 32>}, {pipeline_mode = #tpu.pipeline_mode<synchronous>, transform_indices = @transform_1, window_bounds = array<i64: 8, 128>}, {pipeline_mode = #tpu.pipeline_mode<synchronous>, transform_indices = @transform_2, window_bounds = array<i64: 8, 128>}, {pipeline_mode = #tpu.pipeline_mode<synchronous>, transform_indices = @transform_3, window_bounds = array<i64: 8, 1>}, {pipeline_mode = #tpu.pipeline_mode<synchronous>, transform_indices = @transform_4, window_bounds = array<i64: 32, 512>}, {pipeline_mode = #tpu.pipeline_mode<synchronous>, transform_indices = @transform_5, window_bounds = array<i64: 128, 512>}, {pipeline_mode = #tpu.pipeline_mode<synchronous>, transform_indices = @transform_6, window_bounds = array<i64: 1, 512>}, {pipeline_mode = #tpu.pipeline_mode<synchronous>, transform_indices = @transform_7, window_bounds = array<i64: 4, 8, 128>}]} {
    %c0 = arith.constant 0 : index
    %c0_0 = arith.constant 0 : index
    %0 = vector.load %arg4[%c0, %c0_0] : memref<8x1xi32, #tpu.memory_space<vmem>>, vector<8x1xi32>
    %c0_1 = arith.constant 0 : index
    %c0_2 = arith.constant 0 : index
    %1 = vector.load %arg2[%c0_1, %c0_2] : memref<8x128xf32, #tpu.memory_space<vmem>>, vector<8x128xf32>
    %c0_3 = arith.constant 0 : index
    %c0_4 = arith.constant 0 : index
    %2 = vector.load %arg3[%c0_3, %c0_4] : memref<8x128xf32, #tpu.memory_space<vmem>>, vector<8x128xf32>
    %c0_i32 = arith.constant 0 : i32
    %3 = arith.index_cast %c0_i32 : i32 to index
    %c0_5 = arith.constant 0 : index
    %c0_6 = arith.constant 0 : index
    %4 = vector.load %arg1[%3, %c0_5, %c0_6] : memref<4x8x32xf32, #tpu.memory_space<vmem>>, vector<1x8x32xf32>
    %5 = vector.shape_cast %4 : vector<1x8x32xf32> to vector<8x32xf32>
    %c0_7 = arith.constant 0 : index
    %c0_8 = arith.constant 0 : index
    %6 = vector.load %arg5[%c0_7, %c0_8] : memref<32x512xf32, #tpu.memory_space<vmem>>, vector<32x512xf32>
    %cst = arith.constant dense<0.000000e+00> : vector<8x512xf32>
    %7 = tpu.matmul %5, %6, %cst {dimension_numbers = #tpu.dot_dimension_numbers<[1], [0], [0], [1], [0, 0, 1, 1], [], []>} : vector<8x32xf32>, vector<32x512xf32>, vector<8x512xf32> -> vector<8x512xf32>
    %c0_9 = arith.constant 0 : index
    %c0_10 = arith.constant 0 : index
    %8 = vector.load %arg6[%c0_9, %c0_10] : memref<128x512xf32, #tpu.memory_space<vmem>>, vector<128x512xf32>
    %cst_11 = arith.constant dense<0.000000e+00> : vector<8x512xf32>
    %9 = tpu.matmul %1, %8, %cst_11 {dimension_numbers = #tpu.dot_dimension_numbers<[1], [0], [0], [1], [0, 0, 1, 1], [], []>} : vector<8x128xf32>, vector<128x512xf32>, vector<8x512xf32> -> vector<8x512xf32>
    %10 = arith.addf %7, %9 : vector<8x512xf32>
    %c0_12 = arith.constant 0 : index
    %c0_13 = arith.constant 0 : index
    %11 = vector.load %arg7[%c0_12, %c0_13] : memref<1x512xf32, #tpu.memory_space<vmem>>, vector<1x512xf32>
    %12 = vector.broadcast %11 : vector<1x512xf32> to vector<8x512xf32>
    %13 = arith.addf %10, %12 : vector<8x512xf32>
    %14 = vector.extract_strided_slice %13 {offsets = [0, 0], sizes = [8, 128], strides = [1, 1]} : vector<8x512xf32> to vector<8x128xf32>
    %cst_14 = arith.constant 5.000000e-01 : f32
    %15 = vector.broadcast %cst_14 : f32 to vector<8x128xf32>
    %16 = arith.mulf %15, %14 : vector<8x128xf32>
    %17 = math.tanh %16 : vector<8x128xf32>
    %cst_15 = arith.constant 1.000000e+00 : f32
    %18 = vector.broadcast %cst_15 : f32 to vector<8x128xf32>
    %19 = arith.addf %17, %18 : vector<8x128xf32>
    %cst_16 = arith.constant 5.000000e-01 : f32
    %20 = vector.broadcast %cst_16 : f32 to vector<8x128xf32>
    %21 = arith.mulf %20, %19 : vector<8x128xf32>
    %22 = vector.extract_strided_slice %13 {offsets = [0, 128], sizes = [8, 128], strides = [1, 1]} : vector<8x512xf32> to vector<8x128xf32>
    %cst_17 = arith.constant 5.000000e-01 : f32
    %23 = vector.broadcast %cst_17 : f32 to vector<8x128xf32>
    %24 = arith.mulf %23, %22 : vector<8x128xf32>
    %25 = math.tanh %24 : vector<8x128xf32>
    %cst_18 = arith.constant 1.000000e+00 : f32
    %26 = vector.broadcast %cst_18 : f32 to vector<8x128xf32>
    %27 = arith.addf %25, %26 : vector<8x128xf32>
    %cst_19 = arith.constant 5.000000e-01 : f32
    %28 = vector.broadcast %cst_19 : f32 to vector<8x128xf32>
    %29 = arith.mulf %28, %27 : vector<8x128xf32>
    %30 = vector.extract_strided_slice %13 {offsets = [0, 256], sizes = [8, 128], strides = [1, 1]} : vector<8x512xf32> to vector<8x128xf32>
    %31 = math.tanh %30 : vector<8x128xf32>
    %32 = vector.extract_strided_slice %13 {offsets = [0, 384], sizes = [8, 128], strides = [1, 1]} : vector<8x512xf32> to vector<8x128xf32>
    %cst_20 = arith.constant 5.000000e-01 : f32
    %33 = vector.broadcast %cst_20 : f32 to vector<8x128xf32>
    %34 = arith.mulf %33, %32 : vector<8x128xf32>
    %35 = math.tanh %34 : vector<8x128xf32>
    %cst_21 = arith.constant 1.000000e+00 : f32
    %36 = vector.broadcast %cst_21 : f32 to vector<8x128xf32>
    %37 = arith.addf %35, %36 : vector<8x128xf32>
    %cst_22 = arith.constant 5.000000e-01 : f32
    %38 = vector.broadcast %cst_22 : f32 to vector<8x128xf32>
    %39 = arith.mulf %38, %37 : vector<8x128xf32>
    %40 = arith.mulf %29, %2 : vector<8x128xf32>
    %41 = arith.mulf %21, %31 : vector<8x128xf32>
    %42 = arith.addf %40, %41 : vector<8x128xf32>
    %43 = math.tanh %42 : vector<8x128xf32>
    %44 = arith.mulf %39, %43 : vector<8x128xf32>
    %45 = arith.index_cast %c0_i32 : i32 to index
    %c0_23 = arith.constant 0 : index
    %c0_24 = arith.constant 0 : index
    %46 = vector.load %arg8[%45, %c0_23, %c0_24] : memref<4x8x128xf32, #tpu.memory_space<vmem>>, vector<1x8x128xf32>
    %47 = vector.shape_cast %46 : vector<1x8x128xf32> to vector<8x128xf32>
    %48 = vector.shape_cast %44 : vector<8x128xf32> to vector<1x8x128xf32>
    tpu.vector_store %arg8[%45, %c0_23, %c0_24], %48 {strides = array<i32>} : memref<4x8x128xf32, #tpu.memory_space<vmem>>, vector<1x8x128xf32>,
    %49 = vector.broadcast %c0_i32 : i32 to vector<8x1xi32>
    %50 = arith.cmpi sgt, %0, %49 : vector<8x1xi32>
    %51 = vector.shape_cast %50 : vector<8x1xi1> to vector<8x1xi1>
    %52 = vector.broadcast %51 : vector<8x1xi1> to vector<8x128xi1>
    %53 = arith.select %52, %44, %1 : vector<8x128xi1>, vector<8x128xf32>
    %54 = vector.shape_cast %50 : vector<8x1xi1> to vector<8x1xi1>
    %55 = vector.broadcast %54 : vector<8x1xi1> to vector<8x128xi1>
    %56 = arith.select %55, %42, %2 : vector<8x128xi1>, vector<8x128xf32>
    %c1_i32 = arith.constant 1 : i32
    %57 = arith.index_cast %c1_i32 : i32 to index
    %c0_25 = arith.constant 0 : index
    %c0_26 = arith.constant 0 : index
    %58 = vector.load %arg1[%57, %c0_25, %c0_26] : memref<4x8x32xf32, #tpu.memory_space<vmem>>, vector<1x8x32xf32>
    %59 = vector.shape_cast %58 : vector<1x8x32xf32> to vector<8x32xf32>
    %c0_27 = arith.constant 0 : index
    %c0_28 = arith.constant 0 : index
    %60 = vector.load %arg5[%c0_27, %c0_28] : memref<32x512xf32, #tpu.memory_space<vmem>>, vector<32x512xf32>
    %cst_29 = arith.constant dense<0.000000e+00> : vector<8x512xf32>
    %61 = tpu.matmul %59, %60, %cst_29 {dimension_numbers = #tpu.dot_dimension_numbers<[1], [0], [0], [1], [0, 0, 1, 1], [], []>} : vector<8x32xf32>, vector<32x512xf32>, vector<8x512xf32> -> vector<8x512xf32>
    %c0_30 = arith.constant 0 : index
    %c0_31 = arith.constant 0 : index
    %62 = vector.load %arg6[%c0_30, %c0_31] : memref<128x512xf32, #tpu.memory_space<vmem>>, vector<128x512xf32>
    %cst_32 = arith.constant dense<0.000000e+00> : vector<8x512xf32>
    %63 = tpu.matmul %53, %62, %cst_32 {dimension_numbers = #tpu.dot_dimension_numbers<[1], [0], [0], [1], [0, 0, 1, 1], [], []>} : vector<8x128xf32>, vector<128x512xf32>, vector<8x512xf32> -> vector<8x512xf32>
    %64 = arith.addf %61, %63 : vector<8x512xf32>
    %c0_33 = arith.constant 0 : index
    %c0_34 = arith.constant 0 : index
    %65 = vector.load %arg7[%c0_33, %c0_34] : memref<1x512xf32, #tpu.memory_space<vmem>>, vector<1x512xf32>
    %66 = vector.broadcast %65 : vector<1x512xf32> to vector<8x512xf32>
    %67 = arith.addf %64, %66 : vector<8x512xf32>
    %68 = vector.extract_strided_slice %67 {offsets = [0, 0], sizes = [8, 128], strides = [1, 1]} : vector<8x512xf32> to vector<8x128xf32>
    %cst_35 = arith.constant 5.000000e-01 : f32
    %69 = vector.broadcast %cst_35 : f32 to vector<8x128xf32>
    %70 = arith.mulf %69, %68 : vector<8x128xf32>
    %71 = math.tanh %70 : vector<8x128xf32>
    %cst_36 = arith.constant 1.000000e+00 : f32
    %72 = vector.broadcast %cst_36 : f32 to vector<8x128xf32>
    %73 = arith.addf %71, %72 : vector<8x128xf32>
    %cst_37 = arith.constant 5.000000e-01 : f32
    %74 = vector.broadcast %cst_37 : f32 to vector<8x128xf32>
    %75 = arith.mulf %74, %73 : vector<8x128xf32>
    %76 = vector.extract_strided_slice %67 {offsets = [0, 128], sizes = [8, 128], strides = [1, 1]} : vector<8x512xf32> to vector<8x128xf32>
    %cst_38 = arith.constant 5.000000e-01 : f32
    %77 = vector.broadcast %cst_38 : f32 to vector<8x128xf32>
    %78 = arith.mulf %77, %76 : vector<8x128xf32>
    %79 = math.tanh %78 : vector<8x128xf32>
    %cst_39 = arith.constant 1.000000e+00 : f32
    %80 = vector.broadcast %cst_39 : f32 to vector<8x128xf32>
    %81 = arith.addf %79, %80 : vector<8x128xf32>
    %cst_40 = arith.constant 5.000000e-01 : f32
    %82 = vector.broadcast %cst_40 : f32 to vector<8x128xf32>
    %83 = arith.mulf %82, %81 : vector<8x128xf32>
    %84 = vector.extract_strided_slice %67 {offsets = [0, 256], sizes = [8, 128], strides = [1, 1]} : vector<8x512xf32> to vector<8x128xf32>
    %85 = math.tanh %84 : vector<8x128xf32>
    %86 = vector.extract_strided_slice %67 {offsets = [0, 384], sizes = [8, 128], strides = [1, 1]} : vector<8x512xf32> to vector<8x128xf32>
    %cst_41 = arith.constant 5.000000e-01 : f32
    %87 = vector.broadcast %cst_41 : f32 to vector<8x128xf32>
    %88 = arith.mulf %87, %86 : vector<8x128xf32>
    %89 = math.tanh %88 : vector<8x128xf32>
    %cst_42 = arith.constant 1.000000e+00 : f32
    %90 = vector.broadcast %cst_42 : f32 to vector<8x128xf32>
    %91 = arith.addf %89, %90 : vector<8x128xf32>
    %cst_43 = arith.constant 5.000000e-01 : f32
    %92 = vector.broadcast %cst_43 : f32 to vector<8x128xf32>
    %93 = arith.mulf %92, %91 : vector<8x128xf32>
    %94 = arith.mulf %83, %56 : vector<8x128xf32>
    %95 = arith.mulf %75, %85 : vector<8x128xf32>
    %96 = arith.addf %94, %95 : vector<8x128xf32>
    %97 = math.tanh %96 : vector<8x128xf32>
    %98 = arith.mulf %93, %97 : vector<8x128xf32>
    %99 = arith.index_cast %c1_i32 : i32 to index
    %c0_44 = arith.constant 0 : index
    %c0_45 = arith.constant 0 : index
    %100 = vector.load %arg8[%99, %c0_44, %c0_45] : memref<4x8x128xf32, #tpu.memory_space<vmem>>, vector<1x8x128xf32>
    %101 = vector.shape_cast %100 : vector<1x8x128xf32> to vector<8x128xf32>
    %102 = vector.shape_cast %98 : vector<8x128xf32> to vector<1x8x128xf32>
    tpu.vector_store %arg8[%99, %c0_44, %c0_45], %102 {strides = array<i32>} : memref<4x8x128xf32, #tpu.memory_space<vmem>>, vector<1x8x128xf32>,
    %103 = vector.broadcast %c1_i32 : i32 to vector<8x1xi32>
    %104 = arith.cmpi sgt, %0, %103 : vector<8x1xi32>
    %105 = vector.shape_cast %104 : vector<8x1xi1> to vector<8x1xi1>
    %106 = vector.broadcast %105 : vector<8x1xi1> to vector<8x128xi1>
    %107 = arith.select %106, %98, %53 : vector<8x128xi1>, vector<8x128xf32>
    %108 = vector.shape_cast %104 : vector<8x1xi1> to vector<8x1xi1>
    %109 = vector.broadcast %108 : vector<8x1xi1> to vector<8x128xi1>
    %110 = arith.select %109, %96, %56 : vector<8x128xi1>, vector<8x128xf32>
    %c2_i32 = arith.constant 2 : i32
    %111 = arith.index_cast %c2_i32 : i32 to index
    %c0_46 = arith.constant 0 : index
    %c0_47 = arith.constant 0 : index
    %112 = vector.load %arg1[%111, %c0_46, %c0_47] : memref<4x8x32xf32, #tpu.memory_space<vmem>>, vector<1x8x32xf32>
    %113 = vector.shape_cast %112 : vector<1x8x32xf32> to vector<8x32xf32>
    %c0_48 = arith.constant 0 : index
    %c0_49 = arith.constant 0 : index
    %114 = vector.load %arg5[%c0_48, %c0_49] : memref<32x512xf32, #tpu.memory_space<vmem>>, vector<32x512xf32>
    %cst_50 = arith.constant dense<0.000000e+00> : vector<8x512xf32>
    %115 = tpu.matmul %113, %114, %cst_50 {dimension_numbers = #tpu.dot_dimension_numbers<[1], [0], [0], [1], [0, 0, 1, 1], [], []>} : vector<8x32xf32>, vector<32x512xf32>, vector<8x512xf32> -> vector<8x512xf32>
    %c0_51 = arith.constant 0 : index
    %c0_52 = arith.constant 0 : index
    %116 = vector.load %arg6[%c0_51, %c0_52] : memref<128x512xf32, #tpu.memory_space<vmem>>, vector<128x512xf32>
    %cst_53 = arith.constant dense<0.000000e+00> : vector<8x512xf32>
    %117 = tpu.matmul %107, %116, %cst_53 {dimension_numbers = #tpu.dot_dimension_numbers<[1], [0], [0], [1], [0, 0, 1, 1], [], []>} : vector<8x128xf32>, vector<128x512xf32>, vector<8x512xf32> -> vector<8x512xf32>
    %118 = arith.addf %115, %117 : vector<8x512xf32>
    %c0_54 = arith.constant 0 : index
    %c0_55 = arith.constant 0 : index
    %119 = vector.load %arg7[%c0_54, %c0_55] : memref<1x512xf32, #tpu.memory_space<vmem>>, vector<1x512xf32>
    %120 = vector.broadcast %119 : vector<1x512xf32> to vector<8x512xf32>
    %121 = arith.addf %118, %120 : vector<8x512xf32>
    %122 = vector.extract_strided_slice %121 {offsets = [0, 0], sizes = [8, 128], strides = [1, 1]} : vector<8x512xf32> to vector<8x128xf32>
    %cst_56 = arith.constant 5.000000e-01 : f32
    %123 = vector.broadcast %cst_56 : f32 to vector<8x128xf32>
    %124 = arith.mulf %123, %122 : vector<8x128xf32>
    %125 = math.tanh %124 : vector<8x128xf32>
    %cst_57 = arith.constant 1.000000e+00 : f32
    %126 = vector.broadcast %cst_57 : f32 to vector<8x128xf32>
    %127 = arith.addf %125, %126 : vector<8x128xf32>
    %cst_58 = arith.constant 5.000000e-01 : f32
    %128 = vector.broadcast %cst_58 : f32 to vector<8x128xf32>
    %129 = arith.mulf %128, %127 : vector<8x128xf32>
    %130 = vector.extract_strided_slice %121 {offsets = [0, 128], sizes = [8, 128], strides = [1, 1]} : vector<8x512xf32> to vector<8x128xf32>
    %cst_59 = arith.constant 5.000000e-01 : f32
    %131 = vector.broadcast %cst_59 : f32 to vector<8x128xf32>
    %132 = arith.mulf %131, %130 : vector<8x128xf32>
    %133 = math.tanh %132 : vector<8x128xf32>
    %cst_60 = arith.constant 1.000000e+00 : f32
    %134 = vector.broadcast %cst_60 : f32 to vector<8x128xf32>
    %135 = arith.addf %133, %134 : vector<8x128xf32>
    %cst_61 = arith.constant 5.000000e-01 : f32
    %136 = vector.broadcast %cst_61 : f32 to vector<8x128xf32>
    %137 = arith.mulf %136, %135 : vector<8x128xf32>
    %138 = vector.extract_strided_slice %121 {offsets = [0, 256], sizes = [8, 128], strides = [1, 1]} : vector<8x512xf32> to vector<8x128xf32>
    %139 = math.tanh %138 : vector<8x128xf32>
    %140 = vector.extract_strided_slice %121 {offsets = [0, 384], sizes = [8, 128], strides = [1, 1]} : vector<8x512xf32> to vector<8x128xf32>
    %cst_62 = arith.constant 5.000000e-01 : f32
    %141 = vector.broadcast %cst_62 : f32 to vector<8x128xf32>
    %142 = arith.mulf %141, %140 : vector<8x128xf32>
    %143 = math.tanh %142 : vector<8x128xf32>
    %cst_63 = arith.constant 1.000000e+00 : f32
    %144 = vector.broadcast %cst_63 : f32 to vector<8x128xf32>
    %145 = arith.addf %143, %144 : vector<8x128xf32>
    %cst_64 = arith.constant 5.000000e-01 : f32
    %146 = vector.broadcast %cst_64 : f32 to vector<8x128xf32>
    %147 = arith.mulf %146, %145 : vector<8x128xf32>
    %148 = arith.mulf %137, %110 : vector<8x128xf32>
    %149 = arith.mulf %129, %139 : vector<8x128xf32>
    %150 = arith.addf %148, %149 : vector<8x128xf32>
    %151 = math.tanh %150 : vector<8x128xf32>
    %152 = arith.mulf %147, %151 : vector<8x128xf32>
    %153 = arith.index_cast %c2_i32 : i32 to index
    %c0_65 = arith.constant 0 : index
    %c0_66 = arith.constant 0 : index
    %154 = vector.load %arg8[%153, %c0_65, %c0_66] : memref<4x8x128xf32, #tpu.memory_space<vmem>>, vector<1x8x128xf32>
    %155 = vector.shape_cast %154 : vector<1x8x128xf32> to vector<8x128xf32>
    %156 = vector.shape_cast %152 : vector<8x128xf32> to vector<1x8x128xf32>
    tpu.vector_store %arg8[%153, %c0_65, %c0_66], %156 {strides = array<i32>} : memref<4x8x128xf32, #tpu.memory_space<vmem>>, vector<1x8x128xf32>,
    %157 = vector.broadcast %c2_i32 : i32 to vector<8x1xi32>
    %158 = arith.cmpi sgt, %0, %157 : vector<8x1xi32>
    %159 = vector.shape_cast %158 : vector<8x1xi1> to vector<8x1xi1>
    %160 = vector.broadcast %159 : vector<8x1xi1> to vector<8x128xi1>
    %161 = arith.select %160, %152, %107 : vector<8x128xi1>, vector<8x128xf32>
    %162 = vector.shape_cast %158 : vector<8x1xi1> to vector<8x1xi1>
    %163 = vector.broadcast %162 : vector<8x1xi1> to vector<8x128xi1>
    %164 = arith.select %163, %150, %110 : vector<8x128xi1>, vector<8x128xf32>
    %c3_i32 = arith.constant 3 : i32
    %165 = arith.index_cast %c3_i32 : i32 to index
    %c0_67 = arith.constant 0 : index
    %c0_68 = arith.constant 0 : index
    %166 = vector.load %arg1[%165, %c0_67, %c0_68] : memref<4x8x32xf32, #tpu.memory_space<vmem>>, vector<1x8x32xf32>
    %167 = vector.shape_cast %166 : vector<1x8x32xf32> to vector<8x32xf32>
    %c0_69 = arith.constant 0 : index
    %c0_70 = arith.constant 0 : index
    %168 = vector.load %arg5[%c0_69, %c0_70] : memref<32x512xf32, #tpu.memory_space<vmem>>, vector<32x512xf32>
    %cst_71 = arith.constant dense<0.000000e+00> : vector<8x512xf32>
    %169 = tpu.matmul %167, %168, %cst_71 {dimension_numbers = #tpu.dot_dimension_numbers<[1], [0], [0], [1], [0, 0, 1, 1], [], []>} : vector<8x32xf32>, vector<32x512xf32>, vector<8x512xf32> -> vector<8x512xf32>
    %c0_72 = arith.constant 0 : index
    %c0_73 = arith.constant 0 : index
    %170 = vector.load %arg6[%c0_72, %c0_73] : memref<128x512xf32, #tpu.memory_space<vmem>>, vector<128x512xf32>
    %cst_74 = arith.constant dense<0.000000e+00> : vector<8x512xf32>
    %171 = tpu.matmul %161, %170, %cst_74 {dimension_numbers = #tpu.dot_dimension_numbers<[1], [0], [0], [1], [0, 0, 1, 1], [], []>} : vector<8x128xf32>, vector<128x512xf32>, vector<8x512xf32> -> vector<8x512xf32>
    %172 = arith.addf %169, %171 : vector<8x512xf32>
    %c0_75 = arith.constant 0 : index
    %c0_76 = arith.constant 0 : index
    %173 = vector.load %arg7[%c0_75, %c0_76] : memref<1x512xf32, #tpu.memory_space<vmem>>, vector<1x512xf32>
    %174 = vector.broadcast %173 : vector<1x512xf32> to vector<8x512xf32>
    %175 = arith.addf %172, %174 : vector<8x512xf32>
    %176 = vector.extract_strided_slice %175 {offsets = [0, 0], sizes = [8, 128], strides = [1, 1]} : vector<8x512xf32> to vector<8x128xf32>
    %cst_77 = arith.constant 5.000000e-01 : f32
    %177 = vector.broadcast %cst_77 : f32 to vector<8x128xf32>
    %178 = arith.mulf %177, %176 : vector<8x128xf32>
    %179 = math.tanh %178 : vector<8x128xf32>
    %cst_78 = arith.constant 1.000000e+00 : f32
    %180 = vector.broadcast %cst_78 : f32 to vector<8x128xf32>
    %181 = arith.addf %179, %180 : vector<8x128xf32>
    %cst_79 = arith.constant 5.000000e-01 : f32
    %182 = vector.broadcast %cst_79 : f32 to vector<8x128xf32>
    %183 = arith.mulf %182, %181 : vector<8x128xf32>
    %184 = vector.extract_strided_slice %175 {offsets = [0, 128], sizes = [8, 128], strides = [1, 1]} : vector<8x512xf32> to vector<8x128xf32>
    %cst_80 = arith.constant 5.000000e-01 : f32
    %185 = vector.broadcast %cst_80 : f32 to vector<8x128xf32>
    %186 = arith.mulf %185, %184 : vector<8x128xf32>
    %187 = math.tanh %186 : vector<8x128xf32>
    %cst_81 = arith.constant 1.000000e+00 : f32
    %188 = vector.broadcast %cst_81 : f32 to vector<8x128xf32>
    %189 = arith.addf %187, %188 : vector<8x128xf32>
    %cst_82 = arith.constant 5.000000e-01 : f32
    %190 = vector.broadcast %cst_82 : f32 to vector<8x128xf32>
    %191 = arith.mulf %190, %189 : vector<8x128xf32>
    %192 = vector.extract_strided_slice %175 {offsets = [0, 256], sizes = [8, 128], strides = [1, 1]} : vector<8x512xf32> to vector<8x128xf32>
    %193 = math.tanh %192 : vector<8x128xf32>
    %194 = vector.extract_strided_slice %175 {offsets = [0, 384], sizes = [8, 128], strides = [1, 1]} : vector<8x512xf32> to vector<8x128xf32>
    %cst_83 = arith.constant 5.000000e-01 : f32
    %195 = vector.broadcast %cst_83 : f32 to vector<8x128xf32>
    %196 = arith.mulf %195, %194 : vector<8x128xf32>
    %197 = math.tanh %196 : vector<8x128xf32>
    %cst_84 = arith.constant 1.000000e+00 : f32
    %198 = vector.broadcast %cst_84 : f32 to vector<8x128xf32>
    %199 = arith.addf %197, %198 : vector<8x128xf32>
    %cst_85 = arith.constant 5.000000e-01 : f32
    %200 = vector.broadcast %cst_85 : f32 to vector<8x128xf32>
    %201 = arith.mulf %200, %199 : vector<8x128xf32>
    %202 = arith.mulf %191, %164 : vector<8x128xf32>
    %203 = arith.mulf %183, %193 : vector<8x128xf32>
    %204 = arith.addf %202, %203 : vector<8x128xf32>
    %205 = math.tanh %204 : vector<8x128xf32>
    %206 = arith.mulf %201, %205 : vector<8x128xf32>
    %207 = arith.index_cast %c3_i32 : i32 to index
    %c0_86 = arith.constant 0 : index
    %c0_87 = arith.constant 0 : index
    %208 = vector.load %arg8[%207, %c0_86, %c0_87] : memref<4x8x128xf32, #tpu.memory_space<vmem>>, vector<1x8x128xf32>
    %209 = vector.shape_cast %208 : vector<1x8x128xf32> to vector<8x128xf32>
    %210 = vector.shape_cast %206 : vector<8x128xf32> to vector<1x8x128xf32>
    tpu.vector_store %arg8[%207, %c0_86, %c0_87], %210 {strides = array<i32>} : memref<4x8x128xf32, #tpu.memory_space<vmem>>, vector<1x8x128xf32>,
    %211 = vector.broadcast %c3_i32 : i32 to vector<8x1xi32>
    %212 = arith.cmpi sgt, %0, %211 : vector<8x1xi32>
    %213 = vector.shape_cast %212 : vector<8x1xi1> to vector<8x1xi1>
    %214 = vector.broadcast %213 : vector<8x1xi1> to vector<8x128xi1>
    %215 = arith.select %214, %206, %161 : vector<8x128xi1>, vector<8x128xf32>
    %216 = vector.shape_cast %212 : vector<8x1xi1> to vector<8x1xi1>
    %217 = vector.broadcast %216 : vector<8x1xi1> to vector<8x128xi1>
    %218 = arith.select %217, %204, %164 : vector<8x128xi1>, vector<8x128xf32>
    %c4_i32 = arith.constant 4 : i32
    return
  }
  func.func @transform_0(%arg0: i32) -> (i32, i32, i32) {
    %c0_i32 = arith.constant 0 : i32
    %c0_i32_0 = arith.constant 0 : i32
    %c0_i32_1 = arith.constant 0 : i32
    %c0_i32_2 = arith.constant 0 : i32
    return %c0_i32, %c0_i32_0, %c0_i32_1 : i32, i32, i32
  }
  func.func @transform_1(%arg0: i32) -> (i32, i32) {
    %c0_i32 = arith.constant 0 : i32
    %c0_i32_0 = arith.constant 0 : i32
    %c0_i32_1 = arith.constant 0 : i32
    return %c0_i32, %c0_i32_0 : i32, i32
  }
  func.func @transform_2(%arg0: i32) -> (i32, i32) {
    %c0_i32 = arith.constant 0 : i32
    %c0_i32_0 = arith.constant 0 : i32
    %c0_i32_1 = arith.constant 0 : i32
    return %c0_i32, %c0_i32_0 : i32, i32
  }
  func.func @transform_3(%arg0: i32) -> (i32, i32) {
    %c0_i32 = arith.constant 0 : i32
    %c0_i32_0 = arith.constant 0 : i32
    %c0_i32_1 = arith.constant 0 : i32
    return %c0_i32, %c0_i32_0 : i32, i32
  }
  func.func @transform_4(%arg0: i32) -> (i32, i32) {
    %c0_i32 = arith.constant 0 : i32
    %c0_i32_0 = arith.constant 0 : i32
    %c0_i32_1 = arith.constant 0 : i32
    return %c0_i32, %c0_i32_0 : i32, i32
  }
  func.func @transform_5(%arg0: i32) -> (i32, i32) {
    %c0_i32 = arith.constant 0 : i32
    %c0_i32_0 = arith.constant 0 : i32
    %c0_i32_1 = arith.constant 0 : i32
    return %c0_i32, %c0_i32_0 : i32, i32
  }
  func.func @transform_6(%arg0: i32) -> (i32, i32) {
    %c0_i32 = arith.constant 0 : i32
    %c0_i32_0 = arith.constant 0 : i32
    %c0_i32_1 = arith.constant 0 : i32
    return %c0_i32, %c0_i32_0 : i32, i32
  }
  func.func @transform_7(%arg0: i32) -> (i32, i32, i32) {
    %c0_i32 = arith.constant 0 : i32
    %c0_i32_0 = arith.constant 0 : i32
    %c0_i32_1 = arith.constant 0 : i32
    %c0_i32_2 = arith.constant 0 : i32
    return %c0_i32, %c0_i32_0, %c0_i32_1 : i32, i32, i32
  }
}

</mosaic_0001>

<bundles_post_ra>
// kernel: tpu_custom_call.1
= control target key start
LH: loop header
LB: loop body
LE: loop exit
PB: predicated region body
PF: predicated region fallthrough
CT: control target
= control target key end

     0   :  { %12 = vsyncpa [#allocation3], 0  ;;  %s2681_s0 = inlined_call_operand.hbm [shape: f32[4,8,32], index: 0, kind: input, shape index: {}]   ;;  %s2682_s1 = inlined_call_operand.vmem [shape: f32[8,128], index: 1, kind: input, shape index: {}]   ;;  %s2683_s2 = inlined_call_operand.vmem [shape: f32[8,128], index: 2, kind: input, shape index: {}]   ;;  %s2684_s3 = inlined_call_operand.vmem [shape: s32[8,1], index: 3, kind: input, shape index: {}]   ;;  %s2685_s4 = inlined_call_operand.hbm [shape: f32[32,512], index: 4, kind: input, shape index: {}]   ;;  %s2686_s5 = inlined_call_operand.hbm [shape: f32[128,512], index: 5, kind: input, shape index: {}]   ;;  %s2687_s6 = inlined_call_operand.vmem [shape: f32[1,512], index: 6, kind: input, shape index: {}]   ;;  %s2688_s7 = inlined_call_operand.hbm [shape: f32[4,8,128], index: 7, kind: output, shape index: {}]  }
   0x1   :  { %13 = vsyncpa [#allocation6], 0 }
   0x2   :  { %14 = vsyncpa [#allocation4], 0  ;;  %s2262_s24 = smov [#allocation5]   ;;  %s2168_s28 = scalar_lea.hbm %s2685_s4, 2048 }
   0x3   :  { %s38_s25 = sshll.u32 %s2262_s24, 4  ;;  %p2169_p0 = scmp.ne.s32.totalorder %s2685_s4, %s2168_s28  ;;  %s39_s25 = int_to_ptr.vmem [resolvable:$true] %s38_s25 }
   0x4   :  { %p2172_p1 = scmp.lt.u32.totalorder %s2168_s28, %s2685_s4 }
   0x6   :  { %p2174_p2 = pnand %p2172_p1, %p2169_p0 }
   0x8   :  { %2177 = shalt.err (!%p2174_p2)
}
   0x9   :  { %s2178_s10 = scalar_lea.vmem %s39_s25, 2048  ;;  %p2183_p4 = scmp.lt.s32.totalorder %s39_s25, %s39_s25 }
   0xa   :  { %p2179_p3 = scmp.ne.s32.totalorder %s39_s25, %s2178_s10  ;;  %p2184_p5 = scmp.lt.s32.totalorder %s2178_s10, %s2178_s10 }
   0xc   :  { %p2185_p6 = por %p2184_p5, %p2183_p4 }
   0xe   :  { %p2186_p7 = pnand %p2185_p6, %p2179_p3 }
  0x10   :  { %2189 = shalt.err (!%p2186_p7)
}
  0x11   :  { %s2263_s11 = smov 512   ;;  %s2264_s12 = smov 32  }
  0x12   :  { %44 = dma.hbm_to_vmem [thread:$0]  %s2685_s4, 2048, %s39_s25, [#allocation6], %s2263_s11, %s2263_s11, %s2264_s12  }
  0x13   :  { %s2265_s15 = smov [#allocation2]   ;;  %s2190_s19 = scalar_lea.hbm %s2681_s0, 512 }
  0x14   :  { %s20_s16 = sshll.u32 %s2265_s15, 4  ;;  %p2191_p8 = scmp.ne.s32.totalorder %s2681_s0, %s2190_s19  ;;  %s21_s16 = int_to_ptr.vmem [resolvable:$true] %s20_s16 }
  0x15   :  { %p2194_p9 = scmp.lt.u32.totalorder %s2190_s19, %s2681_s0 }
  0x17   :  { %p2196_p10 = pnand %p2194_p9, %p2191_p8 }
  0x19   :  { %2199 = shalt.err (!%p2196_p10)
}
  0x1a   :  { %s2200_s24 = scalar_lea.vmem %s21_s16, 512  ;;  %p2205_p12 = scmp.lt.s32.totalorder %s21_s16, %s21_s16 }
  0x1b   :  { %p2201_p11 = scmp.ne.s32.totalorder %s21_s16, %s2200_s24  ;;  %p2206_p13 = scmp.lt.s32.totalorder %s2200_s24, %s2200_s24 }
  0x1d   :  { %p2207_p0 = por %p2206_p13, %p2205_p12 }
  0x1f   :  { %p2208_p1 = pnand %p2207_p0, %p2201_p11 }
  0x21   :  { %2211 = shalt.err (!%p2208_p1)
}
  0x22   :  { %s2266_s4 = smov 128   ;;  %s2267_s25 = smov 8  }
  0x23   :  { %26 = dma.hbm_to_vmem [thread:$0]  %s2681_s0, 512, %s21_s16, [#allocation3], %s2266_s4, %s2266_s4, %s2267_s25  }
  0x24   :  { %s2268_s28 = smov [#allocation7]   ;;  %s2212_s9 = scalar_lea.hbm %s2686_s5, 8192 }
  0x25   :  { %s50_s29 = sshll.u32 %s2268_s28, 4  ;;  %p2213_p2 = scmp.ne.s32.totalorder %s2686_s5, %s2212_s9  ;;  %s51_s29 = int_to_ptr.vmem [resolvable:$true] %s50_s29 }
  0x26   :  { %p2216_p3 = scmp.lt.u32.totalorder %s2212_s9, %s2686_s5 }
  0x28   :  { %p2218_p4 = pnand %p2216_p3, %p2213_p2 }
  0x2a   :  { %2221 = shalt.err (!%p2218_p4)
}
  0x2b   :  { %s2222_s17 = scalar_lea.vmem %s51_s29, 8192  ;;  %p2227_p6 = scmp.lt.s32.totalorder %s51_s29, %s51_s29 }
  0x2c   :  { %p2223_p5 = scmp.ne.s32.totalorder %s51_s29, %s2222_s17  ;;  %p2228_p7 = scmp.lt.s32.totalorder %s2222_s17, %s2222_s17 }
  0x2e   :  { %p2229_p8 = por %p2228_p7, %p2227_p6 }
  0x30   :  { %p2230_p9 = pnand %p2229_p8, %p2223_p5 }
  0x32   :  { %2233 = shalt.err (!%p2230_p9)
}
  0x33   :  { %56 = dma.hbm_to_vmem [thread:$0]  %s2686_s5, 8192, %s51_s29, [#allocation6], %s2263_s11, %s2263_s11, %s2264_s12  }
  0x34   :  { %2256 = dma.done.wait [#allocation3], 512  }
  0x35   :  { %2257 = vsyncadd [#allocation3], 4294966784 }
  0x36   :  { %2258 = dma.done.wait [#allocation6], 10240  }
  0x37   :  { %2259 = vsyncadd [#allocation6], 4294957056  ;;  %v2690_v0 = vmov 0.0   ;;  %v2689_v1 = vmov 0   ;;  %v89_v2 = vld [vmem:[#allocation7 + $0x8] sm:$0xff]  ;;  %v91_v4 = vld [vmem:[#allocation7 + $0x18] sm:$0xff] }
  0x38   :  { %216 = vmatprep.mubr.f32.mxu0 %v2690_v0  ;;  %287 = vmatprep.mubr.f32.mxu1 %v2690_v0  ;;  %v93_v3 = vld [vmem:[#allocation7 + $0x28] sm:$0xff]  ;;  %v95_v6 = vld [vmem:[#allocation7 + $0x38] sm:$0xff]  ;;  %v88_v7 = vld [vmem:[#allocation7] sm:$0xff]  ;;  %vm294_vm2 = vcmask 261120  }
  0x39   :  { %2126 = vset.pattern.permute.xlu0 %v2689_v1  ;;  %2127 = vset.pattern.permute.xlu1 %v2689_v1  ;;  %v2361_v5 = vpack.c.bf16 %v93_v3, %v89_v2  ;;  %v92_v8 = vld [vmem:[#allocation7 + $0x20] sm:$0xff]  ;;  %v2363_v9 = vpack.c.bf16 %v95_v6, %v91_v4  ;;  %v90_v11 = vld [vmem:[#allocation7 + $0x10] sm:$0xff]  ;;  %v97_v13 = vld [vmem:[#allocation7 + $0x48] sm:$0xff] }
  0x3a   :  { %v2365_v10 = vpack.c.bf16 %v92_v8, %v88_v7  ;;  %v94_v12 = vld [vmem:[#allocation7 + $0x30] sm:$0xff]  ;;  %v101_v15 = vld [vmem:[#allocation7 + $0x68] sm:$0xff]  ;;  %v99_v16 = vld [vmem:[#allocation7 + $0x58] sm:$0xff] }
  0x3b   :  { %1781 = vmatprep.subr.bf16.mxu0 %v2361_v5  ;;  %v2368_v14 = vpack.c.bf16 %v94_v12, %v90_v11  ;;  %v103_v17 = vld [vmem:[#allocation7 + $0x78] sm:$0xff]  ;;  %1813 = vmatprep.subr.bf16.mxu1 %v2363_v9  ;;  %v2372_v18 = vpack.c.bf16 %v101_v15, %v97_v13  ;;  %v96_v20 = vld [vmem:[#allocation7 + $0x40] sm:$0xff]  ;;  %v98_v22 = vld [vmem:[#allocation7 + $0x50] sm:$0xff] }
  0x3c   :  { %1783 = vmatpush1.bf16.msra.mxu0 %v2365_v10  ;;  %v2374_v19 = vpack.c.bf16 %v103_v17, %v99_v16  ;;  %v100_v21 = vld [vmem:[#allocation7 + $0x60] sm:$0xff]  ;;  %v102_v24 = vld [vmem:[#allocation7 + $0x70] sm:$0xff]  ;;  %v105_v25 = vld [vmem:[#allocation7 + $0x88] sm:$0xff] }
  0x3d   :  { %1815 = vmatpush1.bf16.msra.mxu1 %v2368_v14  ;;  %v2377_v23 = vpack.c.bf16 %v100_v21, %v96_v20  ;;  %v109_v26 = vld [vmem:[#allocation7 + $0xa8] sm:$0xff]  ;;  %1785 = vmatprep.subr.bf16.mxu0 %v2372_v18  ;;  %v2381_v27 = vpack.c.bf16 %v102_v24, %v98_v22  ;;  %v107_v29 = vld [vmem:[#allocation7 + $0x98] sm:$0xff]  ;;  %v104_v31 = vld [vmem:[#allocation7 + $0x80] sm:$0xff] }
  0x3e   :  { %1817 = vmatprep.subr.bf16.mxu1 %v2374_v19  ;;  %v2383_v28 = vpack.c.bf16 %v109_v26, %v105_v25  ;;  %v111_v30 = vld [vmem:[#allocation7 + $0xb8] sm:$0xff]  ;;  %v108_v33 = vld [vmem:[#allocation7 + $0xa0] sm:$0xff]  ;;  %v106_v34 = vld [vmem:[#allocation7 + $0x90] sm:$0xff] }
  0x3f   :  { %v2385_v32 = vpack.c.bf16 %v111_v30, %v107_v29  ;;  %v110_v35 = vld [vmem:[#allocation7 + $0xb0] sm:$0xff]  ;;  %v2388_v36 = vpack.c.bf16 %v108_v33, %v104_v31  ;;  %v113_v37 = vld [vmem:[#allocation7 + $0xc8] sm:$0xff]  ;;  %v115_v39 = vld [vmem:[#allocation7 + $0xd8] sm:$0xff] }
  0x40   :  { %1787 = vmatpush1.bf16.msra.mxu0 %v2377_v23  ;;  %v117_v38 = vld [vmem:[#allocation7 + $0xe8] sm:$0xff]  ;;  %v2392_v40 = vpack.c.bf16 %v110_v35, %v106_v34  ;;  %v119_v42 = vld [vmem:[#allocation7 + $0xf8] sm:$0xff]  ;;  %v112_v43 = vld [vmem:[#allocation7 + $0xc0] sm:$0xff] }
  0x41   :  { %1819 = vmatpush1.bf16.msra.mxu1 %v2381_v27  ;;  %1789 = vmatprep.subr.bf16.mxu0 %v2383_v28  ;;  %v2394_v41 = vpack.c.bf16 %v117_v38, %v113_v37  ;;  %v116_v44 = vld [vmem:[#allocation7 + $0xe0] sm:$0xff]  ;;  %v2397_v45 = vpack.c.bf16 %v119_v42, %v115_v39  ;;  %v114_v46 = vld [vmem:[#allocation7 + $0xd0] sm:$0xff]  ;;  %v121_v48 = vld [vmem:[#allocation7 + $0x108] sm:$0xff] }
  0x42   :  { %1821 = vmatprep.subr.bf16.mxu1 %v2385_v32  ;;  %v118_v47 = vld [vmem:[#allocation7 + $0xf0] sm:$0xff]  ;;  %v125_v49 = vld [vmem:[#allocation7 + $0x128] sm:$0xff]  ;;  %v123_v50 = vld [vmem:[#allocation7 + $0x118] sm:$0xff]  ;;  %v2400_v52 = vpack.c.bf16 %v116_v44, %v112_v43 }
  0x43   :  { %v127_v51 = vld [vmem:[#allocation7 + $0x138] sm:$0xff]  ;;  %v2404_v53 = vpack.c.bf16 %v118_v47, %v114_v46  ;;  %v2406_v54 = vpack.c.bf16 %v125_v49, %v121_v48  ;;  %v120_v55 = vld [vmem:[#allocation7 + $0x100] sm:$0xff]  ;;  %v122_v57 = vld [vmem:[#allocation7 + $0x110] sm:$0xff] }
  0x44   :  { %1791 = vmatpush1.bf16.msra.mxu0 %v2388_v36  ;;  %v124_v56 = vld [vmem:[#allocation7 + $0x120] sm:$0xff]  ;;  %v2409_v58 = vpack.c.bf16 %v127_v51, %v123_v50  ;;  %v126_v59 = vld [vmem:[#allocation7 + $0x130] sm:$0xff]  ;;  %v129_v60 = vld [vmem:[#allocation7 + $0x148] sm:$0xff] }
  0x45   :  { %1823 = vmatpush1.bf16.msra.mxu1 %v2392_v40  ;;  %1793 = vmatprep.subr.bf16.mxu0 %v2394_v41  ;;  %v133_v61 = vld [vmem:[#allocation7 + $0x168] sm:$0xff]  ;;  %v131_v62 = vld [vmem:[#allocation7 + $0x158] sm:$0xff]  ;;  %v2412_v2 = vpack.c.bf16 %v124_v56, %v120_v55  ;;  %v2416_v3 = vpack.c.bf16 %v126_v59, %v122_v57  ;;  %v128_v6 = vld [vmem:[#allocation7 + $0x140] sm:$0xff] }
  0x46   :  { %1825 = vmatprep.subr.bf16.mxu1 %v2397_v45  ;;  %v135_v63 = vld [vmem:[#allocation7 + $0x178] sm:$0xff]  ;;  %v2418_v4 = vpack.c.bf16 %v133_v61, %v129_v60  ;;  %v132_v7 = vld [vmem:[#allocation7 + $0x160] sm:$0xff]  ;;  %v130_v8 = vld [vmem:[#allocation7 + $0x150] sm:$0xff] }
  0x47   :  { %v2421_v11 = vpack.c.bf16 %v135_v63, %v131_v62  ;;  %v134_v12 = vld [vmem:[#allocation7 + $0x170] sm:$0xff]  ;;  %v137_v13 = vld [vmem:[#allocation7 + $0x188] sm:$0xff]  ;;  %v139_v16 = vld [vmem:[#allocation7 + $0x198] sm:$0xff]  ;;  %v2424_v20 = vpack.c.bf16 %v132_v7, %v128_v6 }
  0x48   :  { %1795 = vmatpush1.bf16.msra.mxu0 %v2400_v52  ;;  %v141_v15 = vld [vmem:[#allocation7 + $0x1a8] sm:$0xff]  ;;  %v143_v17 = vld [vmem:[#allocation7 + $0x1b8] sm:$0xff]  ;;  %v2428_v21 = vpack.c.bf16 %v134_v12, %v130_v8  ;;  %v136_v24 = vld [vmem:[#allocation7 + $0x180] sm:$0xff] }
  0x49   :  { %1827 = vmatpush1.bf16.msra.mxu1 %v2404_v53  ;;  %1797 = vmatprep.subr.bf16.mxu0 %v2406_v54  ;;  %v2430_v22 = vpack.c.bf16 %v141_v15, %v137_v13  ;;  %v140_v25 = vld [vmem:[#allocation7 + $0x1a0] sm:$0xff]  ;;  %v138_v26 = vld [vmem:[#allocation7 + $0x190] sm:$0xff]  ;;  %v2433_v29 = vpack.c.bf16 %v143_v17, %v139_v16  ;;  %v145_v31 = vld [vmem:[#allocation7 + $0x1c8] sm:$0xff] }
  0x4a   :  { %1829 = vmatprep.subr.bf16.mxu1 %v2409_v58  ;;  %v142_v30 = vld [vmem:[#allocation7 + $0x1b0] sm:$0xff]  ;;  %v149_v33 = vld [vmem:[#allocation7 + $0x1e8] sm:$0xff]  ;;  %v147_v34 = vld [vmem:[#allocation7 + $0x1d8] sm:$0xff]  ;;  %v2436_v37 = vpack.c.bf16 %v140_v25, %v136_v24 }
  0x4b   :  { %v151_v35 = vld [vmem:[#allocation7 + $0x1f8] sm:$0xff]  ;;  %v2440_v38 = vpack.c.bf16 %v142_v30, %v138_v26  ;;  %v2442_v39 = vpack.c.bf16 %v149_v33, %v145_v31  ;;  %v144_v42 = vld [vmem:[#allocation7 + $0x1c0] sm:$0xff]  ;;  %v146_v44 = vld [vmem:[#allocation7 + $0x1d0] sm:$0xff] }
  0x4c   :  { %1799 = vmatpush1.bf16.msra.mxu0 %v2412_v2  ;;  %v148_v43 = vld [vmem:[#allocation7 + $0x1e0] sm:$0xff]  ;;  %v2445_v46 = vpack.c.bf16 %v151_v35, %v147_v34  ;;  %v150_v47 = vld [vmem:[#allocation7 + $0x1f0] sm:$0xff]  ;;  %v73_v48 = vld [vmem:[#allocation5 + $0x8] sm:$0xff] }
  0x4d   :  { %1831 = vmatpush1.bf16.msra.mxu1 %v2416_v3  ;;  %1801 = vmatprep.subr.bf16.mxu0 %v2418_v4  ;;  %v77_v49 = vld [vmem:[#allocation5 + $0x28] sm:$0xff]  ;;  %v75_v50 = vld [vmem:[#allocation5 + $0x18] sm:$0xff]  ;;  %v2450_v55 = vld [vmem:[%s2684_s3] sm:$0xff]  ;;  %v2453_v56 = vpack.c.bf16 %v148_v43, %v144_v42  ;;  %v2459_v57 = vpack.c.bf16 %v150_v47, %v146_v44  ;;  %v442_v47 = vlaneseq }
  0x4e   :  { %1833 = vmatprep.subr.bf16.mxu1 %v2421_v11  ;;  %v79_v51 = vld [vmem:[#allocation5 + $0x38] sm:$0xff]  ;;  %vm485_vm0 = vcmp.gt.s32.totalorder %v2450_v55, 0  ;;  %vm908_vm1 = vcmp.gt.s32.totalorder %v2450_v55, 1  ;;  %v2461_v59 = vpack.c.bf16 %v77_v49, %v73_v48  ;;  %v72_v60 = vld [vmem:[#allocation5] sm:$0xff]  ;;  %v74_v62 = vld [vmem:[#allocation5 + $0x10] sm:$0xff]  ;;  %vm1331_vm4 = vcmp.gt.s32.totalorder %v2450_v55, 2 }
  0x4f   :  { %v76_v61 = vld [vmem:[#allocation5 + $0x20] sm:$0xff]  ;;  %v486_v63 = vsel %vm485_vm0, 1, %v2689_v1  ;;  %v2465_v6 = vpack.c.bf16 %v79_v51, %v75_v50  ;;  %v78_v7 = vld [vmem:[#allocation5 + $0x30] sm:$0xff]  ;;  %v81_v8 = vld [vmem:[#allocation5 + $0x48] sm:$0xff]  ;;  %v909_v16 = vsel %vm908_vm1, 1, %v2689_v1  ;;  %v443_v48 = vshrl.u32 %v442_v47, 7 }
  0x50   :  { %1803 = vmatpush1.bf16.msra.mxu0 %v2424_v20  ;;  %v85_v12 = vld [vmem:[#allocation5 + $0x68] sm:$0xff]  ;;  %488 = vperm.xlu0 %2126, %v486_v63   ;;  %v83_v13 = vld [vmem:[#allocation5 + $0x58] sm:$0xff]  ;;  %v2474_v17 = vld [vmem:[%s2682_s1] sm:$0xff]  ;;  %v2476_v24 = vpack.c.bf16 %v76_v61, %v72_v60  ;;  %v2480_v25 = vpack.c.bf16 %v78_v7, %v74_v62 }
  0x51   :  { %1835 = vmatpush1.bf16.msra.mxu1 %v2428_v21  ;;  %1805 = vmatprep.subr.bf16.mxu0 %v2430_v22  ;;  %v87_v15 = vld [vmem:[#allocation5 + $0x78] sm:$0xff]  ;;  %v2482_v26 = vpack.c.bf16 %v85_v12, %v81_v8  ;;  %v80_v30 = vld [vmem:[#allocation5 + $0x40] sm:$0xff]  ;;  %v82_v34 = vld [vmem:[#allocation5 + $0x50] sm:$0xff]  ;;  %v2539_v49 = vsub.s32 0, %v443_v48  ;;  %v2544_v51 = vsub.s32 1, %v443_v48  ;;  %v2547_v61 = vsub.s32 2, %v443_v48 }
  0x52   :  { %1837 = vmatprep.subr.bf16.mxu1 %v2433_v29  ;;  %v84_v31 = vld [vmem:[#allocation5 + $0x60] sm:$0xff]  ;;  %v2485_v33 = vpack.c.bf16 %v87_v15, %v83_v13  ;;  %v86_v35 = vld [vmem:[#allocation5 + $0x70] sm:$0xff]  ;;  %v2551_v15 = vsub.s32 3, %v443_v48 }
  0x53   :  { %v2490_v42 = vpack.c.bf16 %v84_v31, %v80_v30  ;;  %v2494_v43 = vpack.c.bf16 %v86_v35, %v82_v34  ;;  %v71_v44 = vld [vmem:[#allocation2] sm:$0xff]  ;;  %2696 = vst [vmem:[#allocation12_spill] sm:$0xff] %v2544_v51  ;;  %2697 = vst [vmem:[#allocation13_spill] sm:$0xff] %v2547_v61 }
  0x54   :  { %1807 = vmatpush1.bf16.msra.mxu0 %v2436_v37  ;;  %911 = vperm.xlu0 %2126, %v909_v16   ;;  %v440_v50 = vld [vmem:[%s2687_s6] sm:$0xf] }
  0x55   :  { %1839 = vmatpush1.bf16.msra.mxu1 %v2440_v38  ;;  %1809 = vmatprep.subr.bf16.mxu0 %v2442_v39  ;;  %v445_v60 = vrot.slane %v440_v50, %v2539_v49  ;;  %v449_v62 = vrot.slane %v440_v50, %v2544_v51  ;;  %v453_v12 = vrot.slane %v440_v50, %v2547_v61  ;;  %v70_v48 = vld [vmem:[%s2683_s2] sm:$0xff] }
  0x56   :  { %1841 = vmatprep.subr.bf16.mxu1 %v2445_v46 }
  0x58   :  { %1811 = vmatpush1.bf16.msra.mxu0 %v2453_v56 }
  0x59   :  { %1843 = vmatpush1.bf16.msra.mxu1 %v2459_v57  ;;  %1845 = vmatprep.subr.bf16.mxu0 %v2461_v59 }
  0x5a   :  { %1853 = vmatprep.subr.bf16.mxu1 %v2465_v6 }
  0x5b   :  { %217 = vmatmul.mubr.f32.vlgmr.msra.gmra.mrb[0].mxu0 %v2474_v17 }
  0x5c   :  { %288 = vmatmul.mubr.f32.vlgmr.msra.gmra.mrb[0].mxu1 %v2474_v17  ;;  %1847 = vmatpush1.bf16.msra.mxu0 %v2476_v24 }
  0x5d   :  { %1855 = vmatpush1.bf16.msra.mxu1 %v2480_v25  ;;  %1849 = vmatprep.subr.bf16.mxu0 %v2482_v26 }
  0x5e   :  { %1857 = vmatprep.subr.bf16.mxu1 %v2485_v33  ;;  %362 = vmatprep.mubr.f32.mxu0 %v2690_v0 }
  0x5f   :  { %433 = vmatprep.mubr.f32.mxu1 %v2690_v0 }
  0x60   :  { %1851 = vmatpush1.bf16.msra.mxu0 %v2490_v42 }
  0x61   :  { %1859 = vmatpush1.bf16.msra.mxu1 %v2494_v43  ;;  %1861 = vmatprep.subr.bf16.mxu0 %v2361_v5 }
  0x62   :  { %1893 = vmatprep.subr.bf16.mxu1 %v2363_v9 }
  0x63   :  { %1772 = vmatmul.mubr.msk.f32.vlgmr.msra.gmra.mrb[0].mxu0 %vm294_vm2, %v71_v44 }
  0x64   :  { %1773 = vmatmul.mubr.msk.f32.vlgmr.msra.gmra.mrb[0].mxu1 %vm294_vm2, %v71_v44  ;;  %1863 = vmatpush1.bf16.msra.mxu0 %v2365_v10  ;;  %v457_v44 = vrot.slane %v440_v50, %v2551_v15 }
  0x65   :  { %1895 = vmatpush1.bf16.msra.mxu1 %v2368_v14  ;;  %1865 = vmatprep.subr.bf16.mxu0 %v2372_v18 }
  0x66   :  { %1897 = vmatprep.subr.bf16.mxu1 %v2374_v19  ;;  %639 = vmatprep.mubr.f32.mxu0 %v2690_v0 }
  0x67   :  { %710 = vmatprep.mubr.f32.mxu1 %v2690_v0 }
  0x68   :  { %1867 = vmatpush1.bf16.msra.mxu0 %v2377_v23 }
  0x69   :  { %1899 = vmatpush1.bf16.msra.mxu1 %v2381_v27  ;;  %1869 = vmatprep.subr.bf16.mxu0 %v2383_v28 }
  0x6a   :  { %1901 = vmatprep.subr.bf16.mxu1 %v2385_v32 }
  0x6c   :  { %1871 = vmatpush1.bf16.msra.mxu0 %v2388_v36 }
  0x6d   :  { %1903 = vmatpush1.bf16.msra.mxu1 %v2392_v40  ;;  %1873 = vmatprep.subr.bf16.mxu0 %v2394_v41 }
  0x6e   :  { %1905 = vmatprep.subr.bf16.mxu1 %v2397_v45 }
  0x70   :  { %1875 = vmatpush1.bf16.msra.mxu0 %v2400_v52 }
  0x71   :  { %1907 = vmatpush1.bf16.msra.mxu1 %v2404_v53  ;;  %1877 = vmatprep.subr.bf16.mxu0 %v2406_v54 }
  0x72   :  { %1909 = vmatprep.subr.bf16.mxu1 %v2409_v58 }
  0x74   :  { %1879 = vmatpush1.bf16.msra.mxu0 %v2412_v2 }
  0x75   :  { %1911 = vmatpush1.bf16.msra.mxu1 %v2416_v3  ;;  %1881 = vmatprep.subr.bf16.mxu0 %v2418_v4 }
  0x76   :  { %1913 = vmatprep.subr.bf16.mxu1 %v2421_v11 }
  0x78   :  { %1883 = vmatpush1.bf16.msra.mxu0 %v2424_v20 }
  0x79   :  { %1915 = vmatpush1.bf16.msra.mxu1 %v2428_v21  ;;  %1885 = vmatprep.subr.bf16.mxu0 %v2430_v22 }
  0x7a   :  { %1917 = vmatprep.subr.bf16.mxu1 %v2433_v29 }
  0x7c   :  { %1887 = vmatpush1.bf16.msra.mxu0 %v2436_v37 }
  0x7d   :  { %1919 = vmatpush1.bf16.msra.mxu1 %v2440_v38  ;;  %1889 = vmatprep.subr.bf16.mxu0 %v2442_v39 }
  0x7e   :  { %1921 = vmatprep.subr.bf16.mxu1 %v2445_v46 }
  0x80   :  { %1891 = vmatpush1.bf16.msra.mxu0 %v2453_v56 }
  0x81   :  { %1923 = vmatpush1.bf16.msra.mxu1 %v2459_v57  ;;  %1925 = vmatprep.subr.bf16.mxu0 %v2461_v59 }
  0x82   :  { %1933 = vmatprep.subr.bf16.mxu1 %v2465_v6 }
 0x136   :  { %v364_v63 = vpop.f32.mrb[0].mxu0 }
 0x137   :  { %v462_v7 = vadd.f32 %v445_v60, %v364_v63  ;;  %v435_v8 = vpop.f32.mrb[0].mxu1  ;;  %v366_v13 = vpop.f32.mrb[1].mxu0 }
 0x138   :  { %v463_v16 = vadd.f32 %v449_v62, %v366_v13  ;;  %v437_v30 = vpop.f32.mrb[1].mxu1  ;;  %v464_v35 = vadd.f32 %v453_v12, %v435_v8  ;;  %v489_v13 = vpop.permute.xlu0 %488 }
 0x139   :  { %v466_v31 = vmul.f32 0.5, %v462_v7  ;;  %v465_v47 = vadd.f32 %v457_v44, %v437_v30  ;;  %vm490_vm3 = vcmp.eq.s32.totalorder %v489_v13, 1  ;;  %v1359_v13 = vld [vmem:[#allocation7 + $0x10] sm:$0xff] }
 0x13a   :  { %v470_v34 = vmul.f32 0.5, %v463_v16 }
 0x13b   :  { %2128 = vtanh.f32 %v466_v31  ;;  %v475_v1 = vmul.f32 0.5, %v465_v47 }
 0x13c   :  { %2130 = vtanh.f32 %v470_v34 }
 0x13d   :  { %2132 = vtanh.f32 %v464_v35 }
 0x13e   :  { %2134 = vtanh.f32 %v475_v1 }
 0x145   :  { %v2129_v0 = vpop.eup %2128 }
 0x146   :  { %v2131_v60 = vpop.eup %2130  ;;  %v468_v63 = vadd.f32 1.0, %v2129_v0 }
 0x147   :  { %v472_v51 = vadd.f32 1.0, %v2131_v60  ;;  %v2133_v62 = vpop.eup %2132  ;;  %v917_v60 = vld [vmem:[#allocation2 + $0x10] sm:$0xff] }
 0x148   :  { %v469_v61 = vmul.f32 0.5, %v468_v63  ;;  %v2135_v30 = vpop.eup %2134  ;;  %v1364_v63 = vld [vmem:[#allocation7 + $0x38] sm:$0xff] }
 0x149   :  { %v473_v7 = vmul.f32 0.5, %v472_v51  ;;  %v477_v31 = vadd.f32 1.0, %v2135_v30  ;;  %v2698_v51 = vmov 0.0  }
 0x14a   :  { %v480_v8 = vmul.f32 %v2133_v62, %v469_v61  ;;  %v1361_v62 = vld [vmem:[#allocation7 + $0x20] sm:$0xff] }
 0x14b   :  { %v479_v12 = vmul.f32 %v473_v7, %v70_v48  ;;  %v478_v0 = vmul.f32 0.5, %v477_v31  ;;  %v1372_v31 = vld [vmem:[#allocation7 + $0x78] sm:$0xff] }
 0x14d   :  { %v481_v50 = vadd.f32 %v480_v8, %v479_v12  ;;  %v1366_v12 = vld [vmem:[#allocation7 + $0x48] sm:$0xff] }
 0x14f   :  { %2136 = vtanh.f32 %v481_v50  ;;  %v2557_v16 = vsel %vm490_vm3, %v481_v50, %v70_v48  ;;  %v1357_v48 = vld [vmem:[#allocation7] sm:$0xff]  ;;  %v1370_v50 = vld [vmem:[#allocation7 + $0x68] sm:$0xff] }
 0x150   :  { %v2024_v30 = vpack.c.bf16 %v1370_v50, %v1366_v12  ;;  %v1399_v12 = vld [vmem:[#allocation7 + $0x150] sm:$0xff] }
 0x151   :  { %v1403_v50 = vld [vmem:[#allocation7 + $0x170] sm:$0xff] }
 0x159   :  { %v2137_v34 = vpop.eup %2136 }
 0x15a   :  { %v483_v1 = vmul.f32 %v2137_v34, %v478_v0  ;;  %v1365_v0 = vld [vmem:[#allocation7 + $0x40] sm:$0xff] }
 0x15b   :  { %v1369_v34 = vld [vmem:[#allocation7 + $0x60] sm:$0xff] }
 0x15c   :  { %v2560_v35 = vsel %vm490_vm3, %v483_v1, %v2474_v17  ;;  %484 = vst [vmem:[#allocation8] sm:$0xff] %v483_v1  ;;  %v494_v17 = vld [vmem:[#allocation2 + $0x8] sm:$0xff] }
 0x15d   :  { %640 = vmatmul.mubr.f32.vlgmr.msra.gmra.mrb[2].mxu0 %v2560_v35  ;;  %711 = vmatmul.mubr.f32.vlgmr.msra.gmra.mrb[2].mxu1 %v2560_v35 }
 0x15e   :  { %1927 = vmatpush1.bf16.msra.mxu0 %v2476_v24  ;;  %1935 = vmatpush1.bf16.msra.mxu1 %v2480_v25 }
 0x15f   :  { %1929 = vmatprep.subr.bf16.mxu0 %v2482_v26  ;;  %1937 = vmatprep.subr.bf16.mxu1 %v2485_v33 }
 0x160   :  { %784 = vmatprep.mubr.f32.mxu0 %v2698_v51  ;;  %855 = vmatprep.mubr.f32.mxu1 %v2698_v51 }
 0x162   :  { %1931 = vmatpush1.bf16.msra.mxu0 %v2490_v42  ;;  %1939 = vmatpush1.bf16.msra.mxu1 %v2494_v43 }
 0x163   :  { %1941 = vmatprep.subr.bf16.mxu0 %v2361_v5  ;;  %1973 = vmatprep.subr.bf16.mxu1 %v2363_v9  ;;  %v2699_v5 = vmov 0  }
 0x164   :  { %v1332_v9 = vsel %vm1331_vm4, 1, %v2699_v5  ;;  %v1371_v5 = vld [vmem:[#allocation7 + $0x70] sm:$0xff] }
 0x165   :  { %1774 = vmatmul.mubr.msk.f32.vlgmr.msra.gmra.mrb[2].mxu0 %vm294_vm2, %v494_v17  ;;  %1775 = vmatmul.mubr.msk.f32.vlgmr.msra.gmra.mrb[2].mxu1 %vm294_vm2, %v494_v17  ;;  %v1367_v17 = vld [vmem:[#allocation7 + $0x50] sm:$0xff] }
 0x166   :  { %1943 = vmatpush1.bf16.msra.mxu0 %v2365_v10  ;;  %1975 = vmatpush1.bf16.msra.mxu1 %v2368_v14  ;;  %v862_v10 = vld [vmem:[%s2687_s6] sm:$0xf] }
 0x167   :  { %1945 = vmatprep.subr.bf16.mxu0 %v2372_v18  ;;  %1977 = vmatprep.subr.bf16.mxu1 %v2374_v19  ;;  %v867_v14 = vrot.slane %v862_v10, %v2539_v49  ;;  %v2700_v18 = vld [vmem:[#allocation12_spill] sm:$0xff] }
 0x168   :  { %1062 = vmatprep.mubr.f32.mxu0 %v2698_v51  ;;  %1133 = vmatprep.mubr.f32.mxu1 %v2698_v51  ;;  %v871_v19 = vrot.slane %v862_v10, %v2700_v18 }
 0x169   :  { %1334 = vperm.xlu1 %2127, %v1332_v9   ;;  %v2058_v9 = vpack.c.bf16 %v1371_v5, %v1367_v17  ;;  %v1409_v17 = vld [vmem:[#allocation7 + $0x1a0] sm:$0xff] }
 0x16a   :  { %1947 = vmatpush1.bf16.msra.mxu0 %v2377_v23  ;;  %1979 = vmatpush1.bf16.msra.mxu1 %v2381_v27 }
 0x16b   :  { %1949 = vmatprep.subr.bf16.mxu0 %v2383_v28  ;;  %1981 = vmatprep.subr.bf16.mxu1 %v2385_v32  ;;  %v2701_v32 = vld [vmem:[#allocation13_spill] sm:$0xff] }
 0x16e   :  { %1951 = vmatpush1.bf16.msra.mxu0 %v2388_v36  ;;  %1983 = vmatpush1.bf16.msra.mxu1 %v2392_v40  ;;  %v875_v36 = vrot.slane %v862_v10, %v2701_v32 }
 0x16f   :  { %1953 = vmatprep.subr.bf16.mxu0 %v2394_v41  ;;  %1985 = vmatprep.subr.bf16.mxu1 %v2397_v45 }
 0x172   :  { %1955 = vmatpush1.bf16.msra.mxu0 %v2400_v52  ;;  %1987 = vmatpush1.bf16.msra.mxu1 %v2404_v53 }
 0x173   :  { %1957 = vmatprep.subr.bf16.mxu0 %v2406_v54  ;;  %1989 = vmatprep.subr.bf16.mxu1 %v2409_v58  ;;  %v879_v58 = vrot.slane %v862_v10, %v2551_v15  ;;  %v1374_v10 = vld [vmem:[#allocation7 + $0x88] sm:$0xff] }
 0x176   :  { %1959 = vmatpush1.bf16.msra.mxu0 %v2412_v2  ;;  %1991 = vmatpush1.bf16.msra.mxu1 %v2416_v3 }
 0x177   :  { %1961 = vmatprep.subr.bf16.mxu0 %v2418_v4  ;;  %1993 = vmatprep.subr.bf16.mxu1 %v2421_v11 }
 0x17a   :  { %1963 = vmatpush1.bf16.msra.mxu0 %v2424_v20  ;;  %1995 = vmatpush1.bf16.msra.mxu1 %v2428_v21 }
 0x17b   :  { %1965 = vmatprep.subr.bf16.mxu0 %v2430_v22  ;;  %1997 = vmatprep.subr.bf16.mxu1 %v2433_v29 }
 0x17e   :  { %1967 = vmatpush1.bf16.msra.mxu0 %v2436_v37  ;;  %1999 = vmatpush1.bf16.msra.mxu1 %v2440_v38 }
 0x17f   :  { %1969 = vmatprep.subr.bf16.mxu0 %v2442_v39  ;;  %2001 = vmatprep.subr.bf16.mxu1 %v2445_v46  ;;  %v912_v39 = vpop.permute.xlu0 %911 }
 0x180   :  { %vm913_vm5 = vcmp.eq.s32.totalorder %v912_v39, 1  ;;  %v1390_v39 = vld [vmem:[#allocation7 + $0x108] sm:$0xff] }
 0x182   :  { %1971 = vmatpush1.bf16.msra.mxu0 %v2453_v56  ;;  %2003 = vmatpush1.bf16.msra.mxu1 %v2459_v57 }
 0x183   :  { %2005 = vmatprep.subr.bf16.mxu0 %v2461_v59  ;;  %2013 = vmatprep.subr.bf16.mxu1 %v2465_v6 }
 0x238   :  { %v786_v23 = vpop.f32.mrb[2].mxu0  ;;  %v857_v27 = vpop.f32.mrb[2].mxu1 }
 0x239   :  { %v884_v28 = vadd.f32 %v867_v14, %v786_v23  ;;  %v788_v40 = vpop.f32.mrb[3].mxu0  ;;  %v859_v41 = vpop.f32.mrb[3].mxu1  ;;  %v886_v54 = vadd.f32 %v875_v36, %v857_v27  ;;  %v1378_v14 = vld [vmem:[#allocation7 + $0xa8] sm:$0xff]  ;;  %v1380_v27 = vld [vmem:[#allocation7 + $0xb8] sm:$0xff]  ;;  %v1377_v36 = vld [vmem:[#allocation7 + $0xa0] sm:$0xff] }
 0x23a   :  { %v885_v45 = vadd.f32 %v871_v19, %v788_v40  ;;  %v887_v2 = vadd.f32 %v879_v58, %v859_v41  ;;  %v1376_v19 = vld [vmem:[#allocation7 + $0x98] sm:$0xff]  ;;  %v2028_v23 = vpack.c.bf16 %v1378_v14, %v1374_v10  ;;  %v1386_v58 = vld [vmem:[#allocation7 + $0xe8] sm:$0xff]  ;;  %v1407_v10 = vld [vmem:[#allocation7 + $0x190] sm:$0xff] }
 0x23b   :  { %v888_v52 = vmul.f32 0.5, %v884_v28  ;;  %v1373_v28 = vld [vmem:[#allocation7 + $0x80] sm:$0xff]  ;;  %v2060_v40 = vpack.c.bf16 %v1380_v27, %v1376_v19  ;;  %v1411_v14 = vld [vmem:[#allocation7 + $0x1b0] sm:$0xff]  ;;  %v1418_v27 = vld [vmem:[#allocation7 + $0x1e8] sm:$0xff] }
 0x23c   :  { %v892_v53 = vmul.f32 0.5, %v885_v45  ;;  %v897_v3 = vmul.f32 0.5, %v887_v2  ;;  %v2030_v41 = vpack.c.bf16 %v1377_v36, %v1373_v28  ;;  %v1375_v45 = vld [vmem:[#allocation7 + $0x90] sm:$0xff]  ;;  %v1384_v2 = vld [vmem:[#allocation7 + $0xd8] sm:$0xff]  ;;  %v2078_v19 = vpack.c.bf16 %v1411_v14, %v1407_v10  ;;  %v1354_v10 = vld [vmem:[#allocation5 + $0x68] sm:$0xff] }
 0x23d   :  { %2138 = vtanh.f32 %v888_v52  ;;  %v1379_v52 = vld [vmem:[#allocation7 + $0xb0] sm:$0xff]  ;;  %v1416_v28 = vld [vmem:[#allocation7 + $0x1d8] sm:$0xff] }
 0x23e   :  { %2140 = vtanh.f32 %v892_v53  ;;  %v2062_v53 = vpack.c.bf16 %v1379_v52, %v1375_v45  ;;  %v1417_v45 = vld [vmem:[#allocation7 + $0x1e0] sm:$0xff]  ;;  %v1352_v14 = vld [vmem:[#allocation5 + $0x58] sm:$0xff] }
 0x23f   :  { %2142 = vtanh.f32 %v886_v54  ;;  %v1382_v54 = vld [vmem:[#allocation7 + $0xc8] sm:$0xff] }
 0x240   :  { %2144 = vtanh.f32 %v897_v3  ;;  %v2032_v3 = vpack.c.bf16 %v1386_v58, %v1382_v54  ;;  %v1415_v54 = vld [vmem:[#allocation7 + $0x1d0] sm:$0xff] }
 0x241   :  { %v1419_v58 = vld [vmem:[#allocation7 + $0x1f0] sm:$0xff] }
 0x247   :  { %v2139_v4 = vpop.eup %2138 }
 0x248   :  { %v2141_v11 = vpop.eup %2140  ;;  %v890_v20 = vadd.f32 1.0, %v2139_v4  ;;  %v1388_v4 = vld [vmem:[#allocation7 + $0xf8] sm:$0xff] }
 0x249   :  { %v894_v21 = vadd.f32 1.0, %v2141_v11  ;;  %v2143_v29 = vpop.eup %2142  ;;  %v1381_v11 = vld [vmem:[#allocation7 + $0xc0] sm:$0xff] }
 0x24a   :  { %v891_v22 = vmul.f32 0.5, %v890_v20  ;;  %v2145_v57 = vpop.eup %2144  ;;  %v1385_v20 = vld [vmem:[#allocation7 + $0xe0] sm:$0xff] }
 0x24b   :  { %v895_v37 = vmul.f32 0.5, %v894_v21  ;;  %v899_v59 = vadd.f32 1.0, %v2145_v57  ;;  %v2064_v21 = vpack.c.bf16 %v1388_v4, %v1384_v2  ;;  %v2082_v2 = vpack.c.bf16 %v1419_v58, %v1415_v54  ;;  %v1346_v4 = vld [vmem:[#allocation5 + $0x28] sm:$0xff] }
 0x24c   :  { %v902_v38 = vmul.f32 %v2143_v29, %v891_v22  ;;  %v2034_v22 = vpack.c.bf16 %v1385_v20, %v1381_v11  ;;  %v1383_v29 = vld [vmem:[#allocation7 + $0xd0] sm:$0xff]  ;;  %v1344_v11 = vld [vmem:[#allocation5 + $0x18] sm:$0xff] }
 0x24d   :  { %v901_v46 = vmul.f32 %v895_v37, %v2557_v16  ;;  %v900_v6 = vmul.f32 0.5, %v899_v59  ;;  %v1387_v37 = vld [vmem:[#allocation7 + $0xf0] sm:$0xff]  ;;  %v1396_v59 = vld [vmem:[#allocation7 + $0x138] sm:$0xff] }
 0x24f   :  { %v903_v55 = vadd.f32 %v902_v38, %v901_v46  ;;  %v2066_v38 = vpack.c.bf16 %v1387_v37, %v1383_v29  ;;  %v1394_v46 = vld [vmem:[#allocation7 + $0x128] sm:$0xff]  ;;  %v1285_v29 = vld [vmem:[%s2687_s6] sm:$0xf] }
 0x250   :  { %v2036_v57 = vpack.c.bf16 %v1394_v46, %v1390_v39  ;;  %v1290_v37 = vrot.slane %v1285_v29, %v2539_v49 }
 0x251   :  { %2146 = vtanh.f32 %v903_v55  ;;  %v2621_v56 = vsel %vm913_vm5, %v903_v55, %v2557_v16  ;;  %v1368_v16 = vld [vmem:[#allocation7 + $0x58] sm:$0xff] }
 0x252   :  { %v2056_v1 = vpack.c.bf16 %v1372_v31, %v1368_v16  ;;  %v1392_v55 = vld [vmem:[#allocation7 + $0x118] sm:$0xff]  ;;  %v2074_v16 = vpack.c.bf16 %v1403_v50, %v1399_v12  ;;  %v1410_v31 = vld [vmem:[#allocation7 + $0x1a8] sm:$0xff] }
 0x25b   :  { %v2147_v61 = vpop.eup %2146 }
 0x25c   :  { %v905_v44 = vmul.f32 %v2147_v61, %v900_v6  ;;  %v1389_v6 = vld [vmem:[#allocation7 + $0x100] sm:$0xff] }
 0x25d   :  { %v1393_v61 = vld [vmem:[#allocation7 + $0x120] sm:$0xff] }
 0x25e   :  { %907 = vst [vmem:[#allocation8 + $0x8] sm:$0xff] %v905_v44  ;;  %v2624_v47 = vsel %vm913_vm5, %v905_v44, %v2560_v35  ;;  %v2026_v35 = vpack.c.bf16 %v1369_v34, %v1365_v0  ;;  %v2068_v44 = vpack.c.bf16 %v1396_v59, %v1392_v55  ;;  %v1408_v0 = vld [vmem:[#allocation7 + $0x198] sm:$0xff] }
 0x25f   :  { %1063 = vmatmul.mubr.f32.vlgmr.msra.gmra.mrb[4].mxu0 %v2624_v47  ;;  %1134 = vmatmul.mubr.f32.vlgmr.msra.gmra.mrb[4].mxu1 %v2624_v47 }
 0x260   :  { %2007 = vmatpush1.bf16.msra.mxu0 %v2476_v24  ;;  %2015 = vmatpush1.bf16.msra.mxu1 %v2480_v25  ;;  %v1358_v24 = vld [vmem:[#allocation7 + $0x8] sm:$0xff] }
 0x261   :  { %2009 = vmatprep.subr.bf16.mxu0 %v2482_v26  ;;  %2017 = vmatprep.subr.bf16.mxu1 %v2485_v33  ;;  %v1362_v25 = vld [vmem:[#allocation7 + $0x28] sm:$0xff]  ;;  %v1360_v26 = vld [vmem:[#allocation7 + $0x18] sm:$0xff] }
 0x262   :  { %1207 = vmatprep.mubr.f32.mxu0 %v2698_v51  ;;  %1278 = vmatprep.mubr.f32.mxu1 %v2698_v51  ;;  %v2020_v33 = vpack.c.bf16 %v1362_v25, %v1358_v24  ;;  %v2052_v7 = vpack.c.bf16 %v1364_v63, %v1360_v26  ;;  %v1391_v24 = vld [vmem:[#allocation7 + $0x110] sm:$0xff]  ;;  %v1402_v63 = vld [vmem:[#allocation7 + $0x168] sm:$0xff] }
 0x263   :  { %v1395_v25 = vld [vmem:[#allocation7 + $0x130] sm:$0xff] }
 0x264   :  { %2011 = vmatpush1.bf16.msra.mxu0 %v2490_v42  ;;  %2019 = vmatpush1.bf16.msra.mxu1 %v2494_v43  ;;  %v2022_v42 = vpack.c.bf16 %v1361_v62, %v1357_v48  ;;  %v1363_v43 = vld [vmem:[#allocation7 + $0x30] sm:$0xff]  ;;  %v2070_v26 = vpack.c.bf16 %v1395_v25, %v1391_v24  ;;  %v1400_v48 = vld [vmem:[#allocation7 + $0x158] sm:$0xff]  ;;  %v1302_v25 = vrot.slane %v1285_v29, %v2551_v15 }
 0x265   :  { %2021 = vmatprep.subr.bf16.mxu0 %v2020_v33  ;;  %v2054_v8 = vpack.c.bf16 %v1363_v43, %v1359_v13  ;;  %2053 = vmatprep.subr.bf16.mxu1 %v2052_v7  ;;  %v1398_v33 = vld [vmem:[#allocation7 + $0x148] sm:$0xff]  ;;  %v1404_v7 = vld [vmem:[#allocation7 + $0x178] sm:$0xff]  ;;  %v1401_v13 = vld [vmem:[#allocation7 + $0x160] sm:$0xff] }
 0x266   :  { %v2040_v62 = vpack.c.bf16 %v1402_v63, %v1398_v33  ;;  %v2072_v43 = vpack.c.bf16 %v1404_v7, %v1400_v48 }
 0x267   :  { %1776 = vmatmul.mubr.msk.f32.vlgmr.msra.gmra.mrb[4].mxu0 %vm294_vm2, %v917_v60  ;;  %1777 = vmatmul.mubr.msk.f32.vlgmr.msra.gmra.mrb[4].mxu1 %vm294_vm2, %v917_v60  ;;  %v2038_v60 = vpack.c.bf16 %v1393_v61, %v1389_v6 }
 0x268   :  { %1485 = vmatprep.mubr.f32.mxu0 %v2698_v51  ;;  %1556 = vmatprep.mubr.f32.mxu1 %v2698_v51 }
 0x269   :  { %2023 = vmatpush1.bf16.msra.mxu0 %v2022_v42  ;;  %2055 = vmatpush1.bf16.msra.mxu1 %v2054_v8  ;;  %v1397_v42 = vld [vmem:[#allocation7 + $0x140] sm:$0xff] }
 0x26a   :  { %2025 = vmatprep.subr.bf16.mxu0 %v2024_v30  ;;  %2057 = vmatprep.subr.bf16.mxu1 %v2056_v1  ;;  %v2042_v8 = vpack.c.bf16 %v1401_v13, %v1397_v42  ;;  %v1406_v30 = vld [vmem:[#allocation7 + $0x188] sm:$0xff]  ;;  %v1412_v1 = vld [vmem:[#allocation7 + $0x1b8] sm:$0xff] }
 0x26b   :  { %v2044_v34 = vpack.c.bf16 %v1410_v31, %v1406_v30  ;;  %v2076_v5 = vpack.c.bf16 %v1412_v1, %v1408_v0  ;;  %v1345_v1 = vld [vmem:[#allocation5 + $0x20] sm:$0xff] }
 0x26d   :  { %2027 = vmatpush1.bf16.msra.mxu0 %v2026_v35  ;;  %2059 = vmatpush1.bf16.msra.mxu1 %v2058_v9  ;;  %v1405_v35 = vld [vmem:[#allocation7 + $0x180] sm:$0xff] }
 0x26e   :  { %2029 = vmatprep.subr.bf16.mxu0 %v2028_v23  ;;  %2061 = vmatprep.subr.bf16.mxu1 %v2060_v40  ;;  %v2046_v9 = vpack.c.bf16 %v1409_v17, %v1405_v35  ;;  %v1414_v23 = vld [vmem:[#allocation7 + $0x1c8] sm:$0xff]  ;;  %v1420_v40 = vld [vmem:[#allocation7 + $0x1f8] sm:$0xff]  ;;  %v1343_v35 = vld [vmem:[#allocation5 + $0x10] sm:$0xff] }
 0x26f   :  { %v2048_v36 = vpack.c.bf16 %v1418_v27, %v1414_v23  ;;  %v2080_v52 = vpack.c.bf16 %v1420_v40, %v1416_v28  ;;  %v1347_v17 = vld [vmem:[#allocation5 + $0x30] sm:$0xff]  ;;  %v1349_v40 = vld [vmem:[#allocation5 + $0x40] sm:$0xff] }
 0x271   :  { %2031 = vmatpush1.bf16.msra.mxu0 %v2030_v41  ;;  %2063 = vmatpush1.bf16.msra.mxu1 %v2062_v53  ;;  %v1413_v41 = vld [vmem:[#allocation7 + $0x1c0] sm:$0xff] }
 0x272   :  { %2033 = vmatprep.subr.bf16.mxu0 %v2032_v3  ;;  %2065 = vmatprep.subr.bf16.mxu1 %v2064_v21  ;;  %v2050_v53 = vpack.c.bf16 %v1417_v45, %v1413_v41  ;;  %v1342_v3 = vld [vmem:[#allocation5 + $0x8] sm:$0xff]  ;;  %v1348_v21 = vld [vmem:[#allocation5 + $0x38] sm:$0xff] }
 0x273   :  { %v2084_v20 = vpack.c.bf16 %v1346_v4, %v1342_v3  ;;  %v1340_v3 = vld [vmem:[#allocation2 + $0x18] sm:$0xff] }
 0x275   :  { %2035 = vmatpush1.bf16.msra.mxu0 %v2034_v22  ;;  %2067 = vmatpush1.bf16.msra.mxu1 %v2066_v38  ;;  %v2092_v22 = vpack.c.bf16 %v1348_v21, %v1344_v11  ;;  %v1294_v38 = vrot.slane %v1285_v29, %v2700_v18 }
 0x276   :  { %2037 = vmatprep.subr.bf16.mxu0 %v2036_v57  ;;  %2069 = vmatprep.subr.bf16.mxu1 %v2068_v44  ;;  %v1298_v57 = vrot.slane %v1285_v29, %v2701_v32 }
 0x279   :  { %2039 = vmatpush1.bf16.msra.mxu0 %v2038_v60  ;;  %2071 = vmatpush1.bf16.msra.mxu1 %v2070_v26 }
 0x27a   :  { %2041 = vmatprep.subr.bf16.mxu0 %v2040_v62  ;;  %2073 = vmatprep.subr.bf16.mxu1 %v2072_v43 }
 0x27d   :  { %2043 = vmatpush1.bf16.msra.mxu0 %v2042_v8  ;;  %2075 = vmatpush1.bf16.msra.mxu1 %v2074_v16  ;;  %v1335_v8 = vpop.permute.xlu1 %1334 }
 0x27e   :  { %2045 = vmatprep.subr.bf16.mxu0 %v2044_v34  ;;  %2077 = vmatprep.subr.bf16.mxu1 %v2076_v5  ;;  %vm1336_vm6 = vcmp.eq.s32.totalorder %v1335_v8, 1  ;;  %v1341_v34 = vld [vmem:[#allocation5] sm:$0xff]  ;;  %v1350_v5 = vld [vmem:[#allocation5 + $0x48] sm:$0xff] }
 0x27f   :  { %v2086_v28 = vpack.c.bf16 %v1345_v1, %v1341_v34  ;;  %v2088_v41 = vpack.c.bf16 %v1354_v10, %v1350_v5 }
 0x281   :  { %2047 = vmatpush1.bf16.msra.mxu0 %v2046_v9  ;;  %2079 = vmatpush1.bf16.msra.mxu1 %v2078_v19  ;;  %v1356_v19 = vld [vmem:[#allocation5 + $0x78] sm:$0xff] }
 0x282   :  { %2049 = vmatprep.subr.bf16.mxu0 %v2048_v36  ;;  %2081 = vmatprep.subr.bf16.mxu1 %v2080_v52  ;;  %v2094_v36 = vpack.c.bf16 %v1347_v17, %v1343_v35  ;;  %v2096_v45 = vpack.c.bf16 %v1356_v19, %v1352_v14  ;;  %v1351_v52 = vld [vmem:[#allocation5 + $0x50] sm:$0xff] }
 0x285   :  { %2051 = vmatpush1.bf16.msra.mxu0 %v2050_v53  ;;  %2083 = vmatpush1.bf16.msra.mxu1 %v2082_v2  ;;  %v1355_v53 = vld [vmem:[#allocation5 + $0x70] sm:$0xff] }
 0x286   :  { %2085 = vmatprep.subr.bf16.mxu0 %v2084_v20  ;;  %2093 = vmatprep.subr.bf16.mxu1 %v2092_v22  ;;  %v2098_v2 = vpack.c.bf16 %v1355_v53, %v1351_v52 }
 0x33a   :  { %v1209_v39 = vpop.f32.mrb[4].mxu0  ;;  %v1280_v46 = vpop.f32.mrb[4].mxu1 }
 0x33b   :  { %v1307_v55 = vadd.f32 %v1290_v37, %v1209_v39  ;;  %v1211_v59 = vpop.f32.mrb[5].mxu0  ;;  %v1282_v6 = vpop.f32.mrb[5].mxu1  ;;  %v1309_v24 = vadd.f32 %v1298_v57, %v1280_v46 }
 0x33c   :  { %v1308_v61 = vadd.f32 %v1294_v38, %v1211_v59  ;;  %v1310_v26 = vadd.f32 %v1302_v25, %v1282_v6 }
 0x33d   :  { %v1311_v44 = vmul.f32 0.5, %v1307_v55 }
 0x33e   :  { %v1315_v60 = vmul.f32 0.5, %v1308_v61  ;;  %v1320_v33 = vmul.f32 0.5, %v1310_v26 }
 0x33f   :  { %2148 = vtanh.f32 %v1311_v44 }
 0x340   :  { %2150 = vtanh.f32 %v1315_v60 }
 0x341   :  { %2152 = vtanh.f32 %v1309_v24 }
 0x342   :  { %2154 = vtanh.f32 %v1320_v33 }
 0x349   :  { %v2149_v63 = vpop.eup %2148 }
 0x34a   :  { %v2151_v48 = vpop.eup %2150  ;;  %v1313_v62 = vadd.f32 1.0, %v2149_v63 }
 0x34b   :  { %v1317_v7 = vadd.f32 1.0, %v2151_v48  ;;  %v2153_v13 = vpop.eup %2152 }
 0x34c   :  { %v1314_v42 = vmul.f32 0.5, %v1313_v62  ;;  %v2155_v31 = vpop.eup %2154 }
 0x34d   :  { %v1318_v43 = vmul.f32 0.5, %v1317_v7  ;;  %v1322_v0 = vadd.f32 1.0, %v2155_v31 }
 0x34e   :  { %v1325_v12 = vmul.f32 %v2153_v13, %v1314_v42 }
 0x34f   :  { %v1324_v50 = vmul.f32 %v1318_v43, %v2621_v56  ;;  %v1323_v9 = vmul.f32 0.5, %v1322_v0 }
 0x351   :  { %v1326_v16 = vadd.f32 %v1325_v12, %v1324_v50 }
 0x353   :  { %2156 = vtanh.f32 %v1326_v16  ;;  %v2650_v30 = vsel %vm1336_vm6, %v1326_v16, %v2621_v56  ;;  %v1353_v56 = vld [vmem:[#allocation5 + $0x60] sm:$0xff] }
 0x354   :  { %v2090_v58 = vpack.c.bf16 %v1353_v56, %v1349_v40 }
 0x35d   :  { %v2157_v23 = vpop.eup %2156 }
 0x35e   :  { %v1328_v27 = vmul.f32 %v2157_v23, %v1323_v9 }
 0x360   :  { %v1337_v54 = vsel %vm1336_vm6, %v1328_v27, %v2624_v47  ;;  %1330 = vst [vmem:[#allocation8 + $0x10] sm:$0xff] %v1328_v27  ;;  %v1708_v47 = vld [vmem:[%s2687_s6] sm:$0xf]  ;;  %s2271_s6 = smov [#allocation8]  }
 0x361   :  { %1486 = vmatmul.mubr.f32.vlgmr.msra.gmra.mrb[6].mxu0 %v1337_v54  ;;  %1557 = vmatmul.mubr.f32.vlgmr.msra.gmra.mrb[6].mxu1 %v1337_v54  ;;  %v1713_v4 = vrot.slane %v1708_v47, %v2539_v49  ;;  %v1717_v11 = vrot.slane %v1708_v47, %v2700_v18  ;;  %v1725_v57 = vrot.slane %v1708_v47, %v2551_v15  ;;  %s1759_s27 = sshll.u32 %s2271_s6, 4  ;;  %s1760_s27 = int_to_ptr.vmem [resolvable:$true] %s1759_s27 }
 0x362   :  { %2087 = vmatpush1.bf16.msra.mxu0 %v2086_v28  ;;  %2095 = vmatpush1.bf16.msra.mxu1 %v2094_v36  ;;  %s2234_s28 = scalar_lea.vmem %s1760_s27, 512  ;;  %p2239_p11 = scmp.lt.s32.totalorder %s1760_s27, %s1760_s27 }
 0x363   :  { %2089 = vmatprep.subr.bf16.mxu0 %v2088_v41  ;;  %2097 = vmatprep.subr.bf16.mxu1 %v2096_v45  ;;  %p2235_p10 = scmp.ne.s32.totalorder %s1760_s27, %s2234_s28  ;;  %p2240_p12 = scmp.lt.s32.totalorder %s2234_s28, %s2234_s28 }
 0x364   :  { %1630 = vmatprep.mubr.f32.mxu0 %v2698_v51  ;;  %1701 = vmatprep.mubr.f32.mxu1 %v2698_v51  ;;  %v1721_v51 = vrot.slane %v1708_v47, %v2701_v32 }
 0x365   :  { %p2241_p13 = por %p2240_p12, %p2239_p11 }
 0x366   :  { %2091 = vmatpush1.bf16.msra.mxu0 %v2090_v58  ;;  %2099 = vmatpush1.bf16.msra.mxu1 %v2098_v2 }
 0x367   :  { %p2242_p0 = pnand %p2241_p13, %p2235_p10 }
 0x369   :  { %1778 = vmatmul.mubr.msk.f32.vlgmr.msra.gmra.mrb[6].mxu0 %vm294_vm2, %v1340_v3  ;;  %1779 = vmatmul.mubr.msk.f32.vlgmr.msra.gmra.mrb[6].mxu1 %vm294_vm2, %v1340_v3 }
 0x43c   :  { %v1632_v20 = vpop.f32.mrb[6].mxu0  ;;  %v1703_v21 = vpop.f32.mrb[6].mxu1 }
 0x43d   :  { %v1730_v22 = vadd.f32 %v1713_v4, %v1632_v20  ;;  %v1634_v29 = vpop.f32.mrb[7].mxu0  ;;  %v1705_v37 = vpop.f32.mrb[7].mxu1  ;;  %v1732_v55 = vadd.f32 %v1721_v51, %v1703_v21 }
 0x43e   :  { %v1731_v38 = vadd.f32 %v1717_v11, %v1634_v29  ;;  %v1733_v59 = vadd.f32 %v1725_v57, %v1705_v37 }
 0x43f   :  { %v1734_v39 = vmul.f32 0.5, %v1730_v22 }
 0x440   :  { %v1738_v46 = vmul.f32 0.5, %v1731_v38  ;;  %v1743_v49 = vmul.f32 0.5, %v1733_v59 }
 0x441   :  { %2158 = vtanh.f32 %v1734_v39 }
 0x442   :  { %2160 = vtanh.f32 %v1738_v46 }
 0x443   :  { %2162 = vtanh.f32 %v1732_v55 }
 0x444   :  { %2164 = vtanh.f32 %v1743_v49 }
 0x44b   :  { %v2159_v6 = vpop.eup %2158 }
 0x44c   :  { %v2161_v18 = vpop.eup %2160  ;;  %v1736_v61 = vadd.f32 1.0, %v2159_v6 }
 0x44d   :  { %v1740_v44 = vadd.f32 1.0, %v2161_v18  ;;  %v2163_v32 = vpop.eup %2162 }
 0x44e   :  { %v1737_v60 = vmul.f32 0.5, %v1736_v61  ;;  %v2165_v63 = vpop.eup %2164 }
 0x44f   :  { %v1741_v24 = vmul.f32 0.5, %v1740_v44  ;;  %v1745_v48 = vadd.f32 1.0, %v2165_v63 }
 0x450   :  { %v1748_v25 = vmul.f32 %v2163_v32, %v1737_v60 }
 0x451   :  { %v1747_v26 = vmul.f32 %v1741_v24, %v2650_v30  ;;  %v1746_v15 = vmul.f32 0.5, %v1745_v48 }
 0x453   :  { %v1749_v33 = vadd.f32 %v1748_v25, %v1747_v26 }
 0x455   :  { %2166 = vtanh.f32 %v1749_v33 }
 0x45f   :  { %v2167_v62 = vpop.eup %2166 }
 0x460   :  { %v1751_v7 = vmul.f32 %v2167_v62, %v1746_v15 }
 0x462   :  { %1753 = vst [vmem:[#allocation8 + $0x18] sm:$0xff] %v1751_v7 }
 0x463   :  { %2245 = shalt.err (!%p2242_p0)
}
 0x464   :  { %s2246_s8 = scalar_lea.hbm %s2688_s7, 512 }
 0x465   :  { %p2247_p1 = scmp.ne.s32.totalorder %s2688_s7, %s2246_s8  ;;  %p2250_p2 = scmp.lt.u32.totalorder %s2246_s8, %s2688_s7 }
 0x467   :  { %p2252_p3 = pnand %p2250_p2, %p2247_p1 }
 0x469   :  { %2255 = shalt.err (!%p2252_p3)
}
 0x46a   :  { %1765 = dma.vmem_to_hbm [thread:$0]  %s1760_s27, 512, %s2688_s7, [#allocation4], %s2266_s4, %s2266_s4, %s2267_s25  }
 0x46b   :  { %2260 = dma.done.wait [#allocation4], 512  }
 0x46c   :  { %2261 = vsyncadd [#allocation4], 4294966784 }
 0x46d   :  { %1769 = vsyncpa [#allocation3], 1 }
 0x46e   :  { %1770 = vsyncpa [#allocation6], 1 }
 0x46f   :  { %1771 = vsyncpa [#allocation4], 1 }

</bundles_post_ra>
